<compile_context>
chip_gen: v5e
topology: v5e:2x2
jax: 0.10.0
libtpu: 0.0.40
codegen_flags: <defaults>
</compile_context>

<pallas_src>
import functools
import math

import jax
import jax.numpy as jnp
from jax import lax
from jax.experimental import pallas as pl
from jax.experimental.pallas import tpu as pltpu


def _round_up(x, m):
    return (x + m - 1) // m * m


def _cdiv(a, b):
    return -(-a // b)


# ----------------------------------------------------------------------------
# Pallas kernel: full decoder stack for one (batch, point-tile) grid step.
# The tile holds `n_chunks` lane-chunks; each chunk is processed independently
# inside a fori_loop so register live ranges stay bounded at large tiles.
# ----------------------------------------------------------------------------
def _decoder_kernel(n_blocks, hidden, n_chunks, has_t, *refs):
    if has_t:
        (data_ref, c_ref, t_ref, tadd_ref, fcp_w_ref, wc_ref, wt_ref,
         fc0_w_ref, fc0_b_ref, fc1_w_ref, fc1_b_ref, fco_w_ref, fco_b_ref,
         out_ref) = refs
    else:
        (data_ref, c_ref, tadd_ref, fcp_w_ref, wc_ref,
         fc0_w_ref, fc0_b_ref, fc1_w_ref, fc1_b_ref, fco_w_ref, fco_b_ref,
         out_ref) = refs
        t_ref = wt_ref = None

    f32, bf16 = jnp.float32, jnp.bfloat16
    relu = lambda v: jnp.maximum(v, 0.0)
    dim = data_ref.shape[2]

    # Small loop-invariant operands (a handful of vregs) hoisted out of the loop.
    tadd = tadd_ref[0]            # (NBH, 1)  f32  all biases (+ per-batch time proj)
    wc = wc_ref[...]              # (NBH, Kc) bf16 fused fc_c weights
    fcp_w = fcp_w_ref[...]        # (H, dim)  f32
    fco_w = fco_w_ref[...]        # (H, 1)    f32
    fco_b = fco_b_ref[...]        # (1, 1)    f32

    def chunk_body(jc, carry):
        # Fused conditioning projection: ONE (NBH, Kc) @ (Kc, chunk) MXU matmul
        # covers every fc_c[i] (kept fused: 3x better M than per-block matmuls).
        proj = jnp.dot(wc, c_ref[0, jc], preferred_element_type=f32)
        if has_t:   # per-row time path: extra (NBH, t_dim) @ (t_dim, chunk) matmul
            proj = proj + jnp.dot(wt_ref[...], t_ref[0, jc],
                                  preferred_element_type=f32)
        proj = proj + tadd

        # fc_p(data): coordinates stay f32; dim is tiny so a VPU FMA chain is
        # ~free and avoids bf16 rounding of the positional inputs themselves.
        d_blk = data_ref[0, jc]                            # (dim, chunk) f32
        p0 = fcp_w[:, 0:1] * d_blk[0:1, :]
        for k in range(1, dim):
            p0 = p0 + fcp_w[:, k:k + 1] * d_blk[k:k + 1, :]

        net = proj[0:hidden, :] + p0
        # TODO(synk): for n_blocks >> 4, switch this to lax.fori_loop over the
        # stacked fc0/fc1 refs to bound live ranges; unrolled is fine for <= 4.
        for i in range(n_blocks):
            if i > 0:
                net = net + proj[i * hidden:(i + 1) * hidden, :]
            # ResnetBlockFC: x + fc_1(relu(fc_0(relu(x))))   (size_in == size_out)
            h = jnp.dot(fc0_w_ref[i], relu(net).astype(bf16),
                        preferred_element_type=f32) + fc0_b_ref[i]
            dx = jnp.dot(fc1_w_ref[i], relu(h).astype(bf16),
                         preferred_element_type=f32) + fc1_b_ref[i]
            net = net + dx

        # fc_out (out_dim == 1): VPU multiply + sublane reduce -> lane-dense row.
        row = jnp.sum(relu(net) * fco_w, axis=0, keepdims=True) + fco_b
        out_ref[0, jc] = row
        return carry

    if n_chunks == 1:
        chunk_body(0, 0)
    else:
        lax.fori_loop(0, n_chunks, chunk_body, 0)


# ----------------------------------------------------------------------------
# Plain-JAX glue: time MLP (SinusoidalPosEmb -> Linear -> Mish -> Linear)
# ----------------------------------------------------------------------------
def _sinusoidal_pos_emb(x, dim):
    half = dim // 2
    emb = math.log(10000.0) / (half - 1)
    freqs = jnp.exp(jnp.arange(half, dtype=jnp.float32) * -emb)
    e = x[:, None].astype(jnp.float32) * freqs[None, :]
    return jnp.concatenate([jnp.sin(e), jnp.cos(e)], axis=-1)


def _mish(x):
    return x * jnp.tanh(jax.nn.softplus(x))


def _time_mlp(time_flat, params):
    t_dim = params["time_lin2_w"].shape[0]
    emb = _sinusoidal_pos_emb(time_flat.astype(jnp.float32), t_dim)
    h = emb @ params["time_lin1_w"].T + params["time_lin1_b"]
    h = _mish(h)
    return h @ params["time_lin2_w"].T + params["time_lin2_b"]


# ----------------------------------------------------------------------------
# Wrapper
# ----------------------------------------------------------------------------
@functools.partial(jax.jit, static_argnames=("tile_n", "lane_chunk"))
def time_local_decoder_forward(data, c, time, params, *, tile_n=2048,
                               lane_chunk=512):
    B, N, dim = data.shape
    c_dim = c.shape[-1]
    n_blocks, hidden = params["fc0_w"].shape[0], params["fc0_w"].shape[1]
    t_dim = params["time_lin2_w"].shape[0]
    out_dim = params["fco_w"].shape[0]
    # TODO(synk): out_dim > 1 would need a small matmul epilogue instead of the
    # VPU multiply+reduce head (module default / forward semantics use out_dim=1).
    assert out_dim == 1
    NBH = n_blocks * hidden
    f32, bf16 = jnp.float32, jnp.bfloat16

    # ---- tiny time MLP (per-batch or per-row) ----
    per_row_time = (time.ndim != 1)
    if per_row_time and time.size != B * N:
        raise ValueError(f"per-row time must have B*N={B * N} elements, got {time.size}")
    t_emb = _time_mlp(time.reshape(-1), params)        # (B, t_dim) or (B*N, t_dim)

    # ---- fold all fc_c biases (+ fc_p bias into block 0, + per-batch time
    #      projection) into one per-batch additive vector -> broadcast time
    #      columns are never written to / re-read from HBM.
    fcc_w = params["fcc_w"]                            # (nb, H, c_dim+t_dim), torch (out,in)
    fcc_w_c, fcc_w_t = fcc_w[..., :c_dim], fcc_w[..., c_dim:]
    bias = params["fcc_b"].at[0].add(params["fcp_b"])  # (nb, H)
    if per_row_time:
        t_add = jnp.broadcast_to(bias.reshape(1, NBH, 1), (B, NBH, 1)).astype(f32)
    else:
        t_proj = jnp.einsum("bt,nht->bnh", t_emb, fcc_w_t)      # (B, nb, H)
        t_add = (t_proj + bias[None]).reshape(B, NBH, 1).astype(f32)

    # ---- lane-chunked feature-major layout: points on lanes, chunk index on a
    #      leading axis (safe dynamic indexing inside the kernel loop).
    chunk = _round_up(min(lane_chunk, _round_up(N, 128)), 128)
    nc_total = _cdiv(N, chunk)
    cpt = max(1, min(tile_n // chunk, nc_total))       # chunks per grid tile (DMA tile)
    # v7x megacore: keep >= 2 grid steps so both TensorCores get work.
    if B * _cdiv(nc_total, cpt) < 2 and nc_total >= 2:
        cpt = _cdiv(nc_total, 2)
    n_tiles = _cdiv(nc_total, cpt)
    nc_pad = n_tiles * cpt
    n_pad = nc_pad * chunk

    def chunked(x, dtype):
        # (B, N, F) -> (B, nc_pad, F, chunk).  Cast FIRST so the transposed HBM
        # write is narrow; pad + reshape + transpose fuse into a single pass.
        x = x.astype(dtype)
        x = jnp.pad(x, ((0, 0), (0, n_pad - N), (0, 0)))
        return jnp.swapaxes(x.reshape(B, nc_pad, chunk, -1), 2, 3)

    inputs = [chunked(data, f32), chunked(c, bf16)]    # coords stay f32 (precision)

    def spec4(f):
        return pl.BlockSpec((1, cpt, f, chunk), lambda b, j: (b, j, 0, 0))

    def full(shape):
        nd = len(shape)
        return pl.BlockSpec(shape, lambda b, j: (0,) * nd)

    in_specs = [spec4(dim), spec4(c_dim)]
    if per_row_time:
        inputs.append(chunked(t_emb.reshape(B, N, t_dim), bf16))
        in_specs.append(spec4(t_dim))

    fcp_w = params["fcp_w"].astype(f32)                # (H, dim), f32 VPU head
    wc = fcc_w_c.reshape(NBH, c_dim).astype(bf16)      # fused fc_c weights
    inputs += [t_add, fcp_w, wc]
    in_specs += [pl.BlockSpec((1, NBH, 1), lambda b, j: (b, 0, 0)),
                 full((hidden, dim)), full((NBH, c_dim))]
    if per_row_time:
        inputs.append(fcc_w_t.reshape(NBH, t_dim).astype(bf16))
        in_specs.append(full((NBH, t_dim)))

    fc0_w = params["fc0_w"].astype(bf16)
    fc1_w = params["fc1_w"].astype(bf16)
    fc0_b = params["fc0_b"].reshape(n_blocks, hidden, 1).astype(f32)
    fc1_b = params["fc1_b"].reshape(n_blocks, hidden, 1).astype(f32)
    fco_w = params["fco_w"].reshape(hidden, 1).astype(f32)
    fco_b = params["fco_b"].reshape(1, 1).astype(f32)
    inputs += [fc0_w, fc0_b, fc1_w, fc1_b, fco_w, fco_b]
    in_specs += [full((n_blocks, hidden, hidden)), full((n_blocks, hidden, 1)),
                 full((n_blocks, hidden, hidden)), full((n_blocks, hidden, 1)),
                 full((hidden, 1)), full((1, 1))]

    # Advisory cost hint: lets XLA schedule the surrounding transpose / time-MLP
    # fusions and the output slice around the custom call.
    flops_pt = 2 * (NBH * c_dim + hidden * dim + n_blocks * 2 * hidden * hidden + hidden)
    if per_row_time:
        flops_pt += 2 * NBH * t_dim
    bytes_pt = dim * 4 + c_dim * 2 + (t_dim * 2 if per_row_time else 0) + 4
    w_bytes = (NBH * c_dim + 2 * n_blocks * hidden * hidden) * 2 + NBH * 4 * B
    cost = pl.CostEstimate(flops=int(B * n_pad * flops_pt), transcendentals=0,
                           bytes_accessed=int(B * n_pad * bytes_pt + w_bytes))

    kernel = functools.partial(_decoder_kernel, n_blocks, hidden, cpt, per_row_time)
    out4 = pl.pallas_call(
        kernel,
        out_shape=jax.ShapeDtypeStruct((B, nc_pad, 1, chunk), f32),
        grid=(B, n_tiles),
        in_specs=in_specs,
        out_specs=pl.BlockSpec((1, cpt, 1, chunk), lambda b, j: (b, j, 0, 0)),
        compiler_params=pltpu.CompilerParams(
            dimension_semantics=("parallel", "parallel"),
            vmem_limit_bytes=32 * 1024 * 1024),
        cost_estimate=cost,
    )(*inputs)

    # Padded tail points (N..n_pad) run the full stack on zeros (ReLU / linear
    # only -> no NaN/transcendental risk) and are sliced off here.
    return out4.reshape(B, n_pad)[:, :N]               # (B, N) == torch .squeeze(-1)


# ----------------------------------------------------------------------------
# Pure-JAX reference (torch semantics, f32 everywhere)
# ----------------------------------------------------------------------------
def reference_forward(data, c, time, params):
    B, N, _ = data.shape
    t_dim = params["time_lin2_w"].shape[0]
    t = _time_mlp(time.reshape(-1), params)
    if time.ndim == 1:
        t = jnp.broadcast_to(t.reshape(B, 1, t_dim), (B, N, t_dim))
    else:
        t = t.reshape(B, N, t_dim)
    c_cat = jnp.concatenate([c.astype(jnp.float32), t], axis=-1)

    relu = lambda x: jnp.maximum(x, 0.0)
    net = data.astype(jnp.float32) @ params["fcp_w"].T + params["fcp_b"]
    for i in range(params["fcc_w"].shape[0]):
        net = net + c_cat @ params["fcc_w"][i].T + params["fcc_b"][i]
        h = relu(net) @ params["fc0_w"][i].T + params["fc0_b"][i]
        dx = relu(h) @ params["fc1_w"][i].T + params["fc1_b"][i]
        net = net + dx
    out = relu(net) @ params["fco_w"].T + params["fco_b"]
    return out[..., 0]


# ----------------------------------------------------------------------------
# Deterministic parameter init (torch nn.Linear (out, in) orientation)
# ----------------------------------------------------------------------------
def init_params(key, *, dim, c_dim, t_dim, hidden, n_blocks, out_dim):
    c_total = c_dim + t_dim

    def lin(k, fan_in, fan_out):
        s = 1.0 / math.sqrt(fan_in)
        kw, kb = jax.random.split(k)
        w = jax.random.uniform(kw, (fan_out, fan_in), jnp.float32, -s, s)
        b = jax.random.uniform(kb, (fan_out,), jnp.float32, -s, s)
        return w, b

    ks = jax.random.split(key, 5)
    fcp_w, fcp_b = lin(ks[0], dim, hidden)
    fco_w, fco_b = lin(ks[1], hidden, out_dim)
    tl1_w, tl1_b = lin(ks[2], t_dim, 2 * t_dim)
    tl2_w, tl2_b = lin(ks[3], 2 * t_dim, t_dim)

    fcc_w, fcc_b, fc0_w, fc0_b, fc1_w, fc1_b = ([] for _ in range(6))
    bkeys = jax.random.split(ks[4], n_blocks * 3)
    for i in range(n_blocks):
        w, b = lin(bkeys[3 * i + 0], c_total, hidden); fcc_w.append(w); fcc_b.append(b)
        w, b = lin(bkeys[3 * i + 1], hidden, hidden);  fc0_w.append(w); fc0_b.append(b)
        # NOTE: torch ResnetBlockFC zero-inits fc_1.weight; small random weights
        # give a non-trivial numerical check (forward semantics are identical).
        w, b = lin(bkeys[3 * i + 2], hidden, hidden);  fc1_w.append(w); fc1_b.append(b)

    return {
        "fcp_w": fcp_w, "fcp_b": fcp_b,
        "fcc_w": jnp.stack(fcc_w), "fcc_b": jnp.stack(fcc_b),
        "fc0_w": jnp.stack(fc0_w), "fc0_b": jnp.stack(fc0_b),
        "fc1_w": jnp.stack(fc1_w), "fc1_b": jnp.stack(fc1_b),
        "fco_w": fco_w, "fco_b": fco_b,
        "time_lin1_w": tl1_w, "time_lin1_b": tl1_b,
        "time_lin2_w": tl2_w, "time_lin2_b": tl2_b,
    }


if __name__ == "__main__":
    # data: (B, N, dim), c: (B, N, c_dim), time: (B,)
    # N=600 is deliberately > one 512-lane chunk so the in-kernel chunk loop and
    # the padded-tail slicing are both exercised, while shapes stay small.
    B, N, dim = 2, 600, 3
    c_dim, t_dim = 32, 16
    hidden, n_blocks, out_dim = 32, 3, 1

    key = jax.random.PRNGKey(0)
    k_data, k_c, k_time, k_params = jax.random.split(key, 4)

    data = jax.random.normal(k_data, (B, N, dim), jnp.float32)
    c = jax.random.normal(k_c, (B, N, c_dim), jnp.float32)
    time = jax.random.uniform(k_time, (B,), jnp.float32) * 100.0

    params = init_params(k_params, dim=dim, c_dim=c_dim, t_dim=t_dim,
                         hidden=hidden, n_blocks=n_blocks, out_dim=out_dim)

    out = jax.block_until_ready(time_local_decoder_forward(data, c, time, params))
    ref = jax.block_until_ready(reference_forward(data, c, time, params))

    assert out.shape == (B, N), out.shape
    # bf16 matmul operands (f32 accumulate) -> loosened tolerance vs. f32 reference.
    max_err = float(jnp.max(jnp.abs(out - ref)))
    assert jnp.allclose(out, ref, atol=5e-2, rtol=5e-2), max_err
    print("KERNEL_OK")
</pallas_src>

<mosaic_0001>
module attributes {stable_mosaic.version = 11 : i64} {
  func.func @_decoder_kernel(%arg0: i32, %arg1: i32, %arg2: memref<1x2x3x512xf32, #tpu.memory_space<vmem>>, %arg3: memref<1x2x32x512xbf16, #tpu.memory_space<vmem>>, %arg4: memref<1x96x1xf32, #tpu.memory_space<vmem>>, %arg5: memref<32x3xf32, #tpu.memory_space<vmem>>, %arg6: memref<96x32xbf16, #tpu.memory_space<vmem>>, %arg7: memref<3x32x32xbf16, #tpu.memory_space<vmem>>, %arg8: memref<3x32x1xf32, #tpu.memory_space<vmem>>, %arg9: memref<3x32x32xbf16, #tpu.memory_space<vmem>>, %arg10: memref<3x32x1xf32, #tpu.memory_space<vmem>>, %arg11: memref<32x1xf32, #tpu.memory_space<vmem>>, %arg12: memref<1x1xf32, #tpu.memory_space<vmem>>, %arg13: memref<1x2x1x512xf32, #tpu.memory_space<vmem>>) attributes {dimension_semantics = [#tpu.dimension_semantics<parallel>, #tpu.dimension_semantics<parallel>], iteration_bounds = array<i64: 2, 1>, scalar_prefetch = 0 : i64, scratch_operands = 0 : i64, tpu.core_type = #tpu.core_type<tc>, window_params = [{transform_indices = @transform_0, window_bounds = array<i64: 1, 2, 3, 512>}, {transform_indices = @transform_1, window_bounds = array<i64: 1, 2, 32, 512>}, {transform_indices = @transform_2, window_bounds = array<i64: 1, 96, 1>}, {pipeline_mode = #tpu.pipeline_mode<synchronous>, transform_indices = @transform_3, window_bounds = array<i64: 32, 3>}, {pipeline_mode = #tpu.pipeline_mode<synchronous>, transform_indices = @transform_4, window_bounds = array<i64: 96, 32>}, {pipeline_mode = #tpu.pipeline_mode<synchronous>, transform_indices = @transform_5, window_bounds = array<i64: 3, 32, 32>}, {pipeline_mode = #tpu.pipeline_mode<synchronous>, transform_indices = @transform_6, window_bounds = array<i64: 3, 32, 1>}, {pipeline_mode = #tpu.pipeline_mode<synchronous>, transform_indices = @transform_7, window_bounds = array<i64: 3, 32, 32>}, {pipeline_mode = #tpu.pipeline_mode<synchronous>, transform_indices = @transform_8, window_bounds = array<i64: 3, 32, 1>}, {pipeline_mode = #tpu.pipeline_mode<synchronous>, transform_indices = @transform_9, window_bounds = array<i64: 32, 1>}, {pipeline_mode = #tpu.pipeline_mode<synchronous>, transform_indices = @transform_10, window_bounds = array<i64: 1, 1>}, {transform_indices = @transform_11, window_bounds = array<i64: 1, 2, 1, 512>}]} {
    %c0 = arith.constant 0 : index
    %c0_0 = arith.constant 0 : index
    %c0_1 = arith.constant 0 : index
    %0 = vector.load %arg4[%c0, %c0_0, %c0_1] : memref<1x96x1xf32, #tpu.memory_space<vmem>>, vector<1x96x1xf32>
    %1 = vector.shape_cast %0 : vector<1x96x1xf32> to vector<96x1xf32>
    %c0_2 = arith.constant 0 : index
    %c0_3 = arith.constant 0 : index
    %2 = vector.load %arg6[%c0_2, %c0_3] : memref<96x32xbf16, #tpu.memory_space<vmem>>, vector<96x32xbf16>
    %c0_4 = arith.constant 0 : index
    %c0_5 = arith.constant 0 : index
    %3 = vector.load %arg5[%c0_4, %c0_5] : memref<32x3xf32, #tpu.memory_space<vmem>>, vector<32x3xf32>
    %c0_6 = arith.constant 0 : index
    %c0_7 = arith.constant 0 : index
    %4 = vector.load %arg11[%c0_6, %c0_7] : memref<32x1xf32, #tpu.memory_space<vmem>>, vector<32x1xf32>
    %c0_8 = arith.constant 0 : index
    %c0_9 = arith.constant 0 : index
    %5 = vector.load %arg12[%c0_8, %c0_9] : memref<1x1xf32, #tpu.memory_space<vmem>>, vector<1x1xf32>
    %c0_i32 = arith.constant 0 : i32
    %c2_i32 = arith.constant 2 : i32
    %6 = arith.addi %c0_i32, %c2_i32 : i32
    %c1_i32 = arith.constant 1 : i32
    scf.for %arg14 = %c0_i32 to %6 step %c1_i32  : i32 {
      %c0_11 = arith.constant 0 : index
      %7 = arith.index_cast %arg14 : i32 to index
      %c0_12 = arith.constant 0 : index
      %c0_13 = arith.constant 0 : index
      %8 = vector.load %arg3[%c0_11, %7, %c0_12, %c0_13] : memref<1x2x32x512xbf16, #tpu.memory_space<vmem>>, vector<1x1x32x512xbf16>
      %9 = vector.shape_cast %8 : vector<1x1x32x512xbf16> to vector<32x512xbf16>
      %cst = arith.constant dense<0.000000e+00> : vector<96x512xf32>
      %10 = tpu.matmul %2, %9, %cst {dimension_numbers = #tpu.dot_dimension_numbers<[1], [0], [0], [1], [0, 0, 1, 1], [], []>} : vector<96x32xbf16>, vector<32x512xbf16>, vector<96x512xf32> -> vector<96x512xf32>
      %11 = vector.broadcast %1 : vector<96x1xf32> to vector<96x512xf32>
      %12 = arith.addf %10, %11 : vector<96x512xf32>
      %c0_14 = arith.constant 0 : index
      %13 = arith.index_cast %arg14 : i32 to index
      %c0_15 = arith.constant 0 : index
      %c0_16 = arith.constant 0 : index
      %14 = vector.load %arg2[%c0_14, %13, %c0_15, %c0_16] : memref<1x2x3x512xf32, #tpu.memory_space<vmem>>, vector<1x1x3x512xf32>
      %15 = vector.shape_cast %14 : vector<1x1x3x512xf32> to vector<3x512xf32>
      %16 = vector.extract_strided_slice %3 {offsets = [0, 0], sizes = [32, 1], strides = [1, 1]} : vector<32x3xf32> to vector<32x1xf32>
      %17 = vector.extract_strided_slice %15 {offsets = [0, 0], sizes = [1, 512], strides = [1, 1]} : vector<3x512xf32> to vector<1x512xf32>
      %18 = vector.broadcast %16 : vector<32x1xf32> to vector<32x512xf32>
      %19 = vector.broadcast %17 : vector<1x512xf32> to vector<32x512xf32>
      %20 = arith.mulf %18, %19 : vector<32x512xf32>
      %21 = vector.extract_strided_slice %3 {offsets = [0, 1], sizes = [32, 1], strides = [1, 1]} : vector<32x3xf32> to vector<32x1xf32>
      %22 = vector.extract_strided_slice %15 {offsets = [1, 0], sizes = [1, 512], strides = [1, 1]} : vector<3x512xf32> to vector<1x512xf32>
      %23 = vector.broadcast %21 : vector<32x1xf32> to vector<32x512xf32>
      %24 = vector.broadcast %22 : vector<1x512xf32> to vector<32x512xf32>
      %25 = arith.mulf %23, %24 : vector<32x512xf32>
      %26 = arith.addf %20, %25 : vector<32x512xf32>
      %27 = vector.extract_strided_slice %3 {offsets = [0, 2], sizes = [32, 1], strides = [1, 1]} : vector<32x3xf32> to vector<32x1xf32>
      %28 = vector.extract_strided_slice %15 {offsets = [2, 0], sizes = [1, 512], strides = [1, 1]} : vector<3x512xf32> to vector<1x512xf32>
      %29 = vector.broadcast %27 : vector<32x1xf32> to vector<32x512xf32>
      %30 = vector.broadcast %28 : vector<1x512xf32> to vector<32x512xf32>
      %31 = arith.mulf %29, %30 : vector<32x512xf32>
      %32 = arith.addf %26, %31 : vector<32x512xf32>
      %33 = vector.extract_strided_slice %12 {offsets = [0, 0], sizes = [32, 512], strides = [1, 1]} : vector<96x512xf32> to vector<32x512xf32>
      %34 = arith.addf %33, %32 : vector<32x512xf32>
      %c0_17 = arith.constant 0 : index
      %c0_18 = arith.constant 0 : index
      %c0_19 = arith.constant 0 : index
      %35 = vector.load %arg7[%c0_17, %c0_18, %c0_19] : memref<3x32x32xbf16, #tpu.memory_space<vmem>>, vector<1x32x32xbf16>
      %36 = vector.shape_cast %35 : vector<1x32x32xbf16> to vector<32x32xbf16>
      %cst_20 = arith.constant 0.000000e+00 : f32
      %37 = vector.broadcast %cst_20 : f32 to vector<32x512xf32>
      %38 = arith.maximumf %34, %37 : vector<32x512xf32>
      %39 = arith.truncf %38 : vector<32x512xf32> to vector<32x512xbf16>
      %cst_21 = arith.constant dense<0.000000e+00> : vector<32x512xf32>
      %40 = tpu.matmul %36, %39, %cst_21 {dimension_numbers = #tpu.dot_dimension_numbers<[1], [0], [0], [1], [0, 0, 1, 1], [], []>} : vector<32x32xbf16>, vector<32x512xbf16>, vector<32x512xf32> -> vector<32x512xf32>
      %c0_22 = arith.constant 0 : index
      %c0_23 = arith.constant 0 : index
      %c0_24 = arith.constant 0 : index
      %41 = vector.load %arg8[%c0_22, %c0_23, %c0_24] : memref<3x32x1xf32, #tpu.memory_space<vmem>>, vector<1x32x1xf32>
      %42 = vector.shape_cast %41 : vector<1x32x1xf32> to vector<32x1xf32>
      %43 = vector.broadcast %42 : vector<32x1xf32> to vector<32x512xf32>
      %44 = arith.addf %40, %43 : vector<32x512xf32>
      %c0_25 = arith.constant 0 : index
      %c0_26 = arith.constant 0 : index
      %c0_27 = arith.constant 0 : index
      %45 = vector.load %arg9[%c0_25, %c0_26, %c0_27] : memref<3x32x32xbf16, #tpu.memory_space<vmem>>, vector<1x32x32xbf16>
      %46 = vector.shape_cast %45 : vector<1x32x32xbf16> to vector<32x32xbf16>
      %cst_28 = arith.constant 0.000000e+00 : f32
      %47 = vector.broadcast %cst_28 : f32 to vector<32x512xf32>
      %48 = arith.maximumf %44, %47 : vector<32x512xf32>
      %49 = arith.truncf %48 : vector<32x512xf32> to vector<32x512xbf16>
      %cst_29 = arith.constant dense<0.000000e+00> : vector<32x512xf32>
      %50 = tpu.matmul %46, %49, %cst_29 {dimension_numbers = #tpu.dot_dimension_numbers<[1], [0], [0], [1], [0, 0, 1, 1], [], []>} : vector<32x32xbf16>, vector<32x512xbf16>, vector<32x512xf32> -> vector<32x512xf32>
      %c0_30 = arith.constant 0 : index
      %c0_31 = arith.constant 0 : index
      %c0_32 = arith.constant 0 : index
      %51 = vector.load %arg10[%c0_30, %c0_31, %c0_32] : memref<3x32x1xf32, #tpu.memory_space<vmem>>, vector<1x32x1xf32>
      %52 = vector.shape_cast %51 : vector<1x32x1xf32> to vector<32x1xf32>
      %53 = vector.broadcast %52 : vector<32x1xf32> to vector<32x512xf32>
      %54 = arith.addf %50, %53 : vector<32x512xf32>
      %55 = arith.addf %34, %54 : vector<32x512xf32>
      %56 = vector.extract_strided_slice %12 {offsets = [32, 0], sizes = [32, 512], strides = [1, 1]} : vector<96x512xf32> to vector<32x512xf32>
      %57 = arith.addf %55, %56 : vector<32x512xf32>
      %c1 = arith.constant 1 : index
      %c0_33 = arith.constant 0 : index
      %c0_34 = arith.constant 0 : index
      %58 = vector.load %arg7[%c1, %c0_33, %c0_34] : memref<3x32x32xbf16, #tpu.memory_space<vmem>>, vector<1x32x32xbf16>
      %59 = vector.shape_cast %58 : vector<1x32x32xbf16> to vector<32x32xbf16>
      %cst_35 = arith.constant 0.000000e+00 : f32
      %60 = vector.broadcast %cst_35 : f32 to vector<32x512xf32>
      %61 = arith.maximumf %57, %60 : vector<32x512xf32>
      %62 = arith.truncf %61 : vector<32x512xf32> to vector<32x512xbf16>
      %cst_36 = arith.constant dense<0.000000e+00> : vector<32x512xf32>
      %63 = tpu.matmul %59, %62, %cst_36 {dimension_numbers = #tpu.dot_dimension_numbers<[1], [0], [0], [1], [0, 0, 1, 1], [], []>} : vector<32x32xbf16>, vector<32x512xbf16>, vector<32x512xf32> -> vector<32x512xf32>
      %c1_37 = arith.constant 1 : index
      %c0_38 = arith.constant 0 : index
      %c0_39 = arith.constant 0 : index
      %64 = vector.load %arg8[%c1_37, %c0_38, %c0_39] : memref<3x32x1xf32, #tpu.memory_space<vmem>>, vector<1x32x1xf32>
      %65 = vector.shape_cast %64 : vector<1x32x1xf32> to vector<32x1xf32>
      %66 = vector.broadcast %65 : vector<32x1xf32> to vector<32x512xf32>
      %67 = arith.addf %63, %66 : vector<32x512xf32>
      %c1_40 = arith.constant 1 : index
      %c0_41 = arith.constant 0 : index
      %c0_42 = arith.constant 0 : index
      %68 = vector.load %arg9[%c1_40, %c0_41, %c0_42] : memref<3x32x32xbf16, #tpu.memory_space<vmem>>, vector<1x32x32xbf16>
      %69 = vector.shape_cast %68 : vector<1x32x32xbf16> to vector<32x32xbf16>
      %cst_43 = arith.constant 0.000000e+00 : f32
      %70 = vector.broadcast %cst_43 : f32 to vector<32x512xf32>
      %71 = arith.maximumf %67, %70 : vector<32x512xf32>
      %72 = arith.truncf %71 : vector<32x512xf32> to vector<32x512xbf16>
      %cst_44 = arith.constant dense<0.000000e+00> : vector<32x512xf32>
      %73 = tpu.matmul %69, %72, %cst_44 {dimension_numbers = #tpu.dot_dimension_numbers<[1], [0], [0], [1], [0, 0, 1, 1], [], []>} : vector<32x32xbf16>, vector<32x512xbf16>, vector<32x512xf32> -> vector<32x512xf32>
      %c1_45 = arith.constant 1 : index
      %c0_46 = arith.constant 0 : index
      %c0_47 = arith.constant 0 : index
      %74 = vector.load %arg10[%c1_45, %c0_46, %c0_47] : memref<3x32x1xf32, #tpu.memory_space<vmem>>, vector<1x32x1xf32>
      %75 = vector.shape_cast %74 : vector<1x32x1xf32> to vector<32x1xf32>
      %76 = vector.broadcast %75 : vector<32x1xf32> to vector<32x512xf32>
      %77 = arith.addf %73, %76 : vector<32x512xf32>
      %78 = arith.addf %57, %77 : vector<32x512xf32>
      %79 = vector.extract_strided_slice %12 {offsets = [64, 0], sizes = [32, 512], strides = [1, 1]} : vector<96x512xf32> to vector<32x512xf32>
      %80 = arith.addf %78, %79 : vector<32x512xf32>
      %c2 = arith.constant 2 : index
      %c0_48 = arith.constant 0 : index
      %c0_49 = arith.constant 0 : index
      %81 = vector.load %arg7[%c2, %c0_48, %c0_49] : memref<3x32x32xbf16, #tpu.memory_space<vmem>>, vector<1x32x32xbf16>
      %82 = vector.shape_cast %81 : vector<1x32x32xbf16> to vector<32x32xbf16>
      %cst_50 = arith.constant 0.000000e+00 : f32
      %83 = vector.broadcast %cst_50 : f32 to vector<32x512xf32>
      %84 = arith.maximumf %80, %83 : vector<32x512xf32>
      %85 = arith.truncf %84 : vector<32x512xf32> to vector<32x512xbf16>
      %cst_51 = arith.constant dense<0.000000e+00> : vector<32x512xf32>
      %86 = tpu.matmul %82, %85, %cst_51 {dimension_numbers = #tpu.dot_dimension_numbers<[1], [0], [0], [1], [0, 0, 1, 1], [], []>} : vector<32x32xbf16>, vector<32x512xbf16>, vector<32x512xf32> -> vector<32x512xf32>
      %c2_52 = arith.constant 2 : index
      %c0_53 = arith.constant 0 : index
      %c0_54 = arith.constant 0 : index
      %87 = vector.load %arg8[%c2_52, %c0_53, %c0_54] : memref<3x32x1xf32, #tpu.memory_space<vmem>>, vector<1x32x1xf32>
      %88 = vector.shape_cast %87 : vector<1x32x1xf32> to vector<32x1xf32>
      %89 = vector.broadcast %88 : vector<32x1xf32> to vector<32x512xf32>
      %90 = arith.addf %86, %89 : vector<32x512xf32>
      %c2_55 = arith.constant 2 : index
      %c0_56 = arith.constant 0 : index
      %c0_57 = arith.constant 0 : index
      %91 = vector.load %arg9[%c2_55, %c0_56, %c0_57] : memref<3x32x32xbf16, #tpu.memory_space<vmem>>, vector<1x32x32xbf16>
      %92 = vector.shape_cast %91 : vector<1x32x32xbf16> to vector<32x32xbf16>
      %cst_58 = arith.constant 0.000000e+00 : f32
      %93 = vector.broadcast %cst_58 : f32 to vector<32x512xf32>
      %94 = arith.maximumf %90, %93 : vector<32x512xf32>
      %95 = arith.truncf %94 : vector<32x512xf32> to vector<32x512xbf16>
      %cst_59 = arith.constant dense<0.000000e+00> : vector<32x512xf32>
      %96 = tpu.matmul %92, %95, %cst_59 {dimension_numbers = #tpu.dot_dimension_numbers<[1], [0], [0], [1], [0, 0, 1, 1], [], []>} : vector<32x32xbf16>, vector<32x512xbf16>, vector<32x512xf32> -> vector<32x512xf32>
      %c2_60 = arith.constant 2 : index
      %c0_61 = arith.constant 0 : index
      %c0_62 = arith.constant 0 : index
      %97 = vector.load %arg10[%c2_60, %c0_61, %c0_62] : memref<3x32x1xf32, #tpu.memory_space<vmem>>, vector<1x32x1xf32>
      %98 = vector.shape_cast %97 : vector<1x32x1xf32> to vector<32x1xf32>
      %99 = vector.broadcast %98 : vector<32x1xf32> to vector<32x512xf32>
      %100 = arith.addf %96, %99 : vector<32x512xf32>
      %101 = arith.addf %80, %100 : vector<32x512xf32>
      %cst_63 = arith.constant 0.000000e+00 : f32
      %102 = vector.broadcast %cst_63 : f32 to vector<32x512xf32>
      %103 = arith.maximumf %101, %102 : vector<32x512xf32>
      %104 = vector.broadcast %4 : vector<32x1xf32> to vector<32x512xf32>
      %105 = arith.mulf %103, %104 : vector<32x512xf32>
      %cst_64 = arith.constant dense<0.000000e+00> : vector<512xf32>
      %106 = vector.multi_reduction <add>, %105, %cst_64 [0] : vector<32x512xf32> to vector<512xf32>
      %107 = vector.shape_cast %106 : vector<512xf32> to vector<1x512xf32>
      %108 = vector.broadcast %5 : vector<1x1xf32> to vector<1x512xf32>
      %109 = arith.addf %107, %108 : vector<1x512xf32>
      %c0_65 = arith.constant 0 : index
      %110 = arith.index_cast %arg14 : i32 to index
      %c0_66 = arith.constant 0 : index
      %c0_67 = arith.constant 0 : index
      %111 = vector.load %arg13[%c0_65, %110, %c0_66, %c0_67] : memref<1x2x1x512xf32, #tpu.memory_space<vmem>>, vector<1x1x1x512xf32>
      %112 = vector.shape_cast %111 : vector<1x1x1x512xf32> to vector<1x512xf32>
      %113 = vector.shape_cast %109 : vector<1x512xf32> to vector<1x1x1x512xf32>
      tpu.vector_store %arg13[%c0_65, %110, %c0_66, %c0_67], %113 {strides = array<i32>} : memref<1x2x1x512xf32, #tpu.memory_space<vmem>>, vector<1x1x1x512xf32>,
    }
    %c2_i32_10 = arith.constant 2 : i32
    return
  }
  func.func @transform_0(%arg0: i32, %arg1: i32) -> (i32, i32, i32, i32) {
    %c0_i32 = arith.constant 0 : i32
    %c0_i32_0 = arith.constant 0 : i32
    %c0_i32_1 = arith.constant 0 : i32
    return %arg0, %arg1, %c0_i32, %c0_i32_0 : i32, i32, i32, i32
  }
  func.func @transform_1(%arg0: i32, %arg1: i32) -> (i32, i32, i32, i32) {
    %c0_i32 = arith.constant 0 : i32
    %c0_i32_0 = arith.constant 0 : i32
    %c0_i32_1 = arith.constant 0 : i32
    return %arg0, %arg1, %c0_i32, %c0_i32_0 : i32, i32, i32, i32
  }
  func.func @transform_2(%arg0: i32, %arg1: i32) -> (i32, i32, i32) {
    %c0_i32 = arith.constant 0 : i32
    %c0_i32_0 = arith.constant 0 : i32
    %c0_i32_1 = arith.constant 0 : i32
    return %arg0, %c0_i32, %c0_i32_0 : i32, i32, i32
  }
  func.func @transform_3(%arg0: i32, %arg1: i32) -> (i32, i32) {
    %c0_i32 = arith.constant 0 : i32
    %c0_i32_0 = arith.constant 0 : i32
    %c0_i32_1 = arith.constant 0 : i32
    return %c0_i32, %c0_i32_0 : i32, i32
  }
  func.func @transform_4(%arg0: i32, %arg1: i32) -> (i32, i32) {
    %c0_i32 = arith.constant 0 : i32
    %c0_i32_0 = arith.constant 0 : i32
    %c0_i32_1 = arith.constant 0 : i32
    return %c0_i32, %c0_i32_0 : i32, i32
  }
  func.func @transform_5(%arg0: i32, %arg1: i32) -> (i32, i32, i32) {
    %c0_i32 = arith.constant 0 : i32
    %c0_i32_0 = arith.constant 0 : i32
    %c0_i32_1 = arith.constant 0 : i32
    %c0_i32_2 = arith.constant 0 : i32
    return %c0_i32, %c0_i32_0, %c0_i32_1 : i32, i32, i32
  }
  func.func @transform_6(%arg0: i32, %arg1: i32) -> (i32, i32, i32) {
    %c0_i32 = arith.constant 0 : i32
    %c0_i32_0 = arith.constant 0 : i32
    %c0_i32_1 = arith.constant 0 : i32
    %c0_i32_2 = arith.constant 0 : i32
    return %c0_i32, %c0_i32_0, %c0_i32_1 : i32, i32, i32
  }
  func.func @transform_7(%arg0: i32, %arg1: i32) -> (i32, i32, i32) {
    %c0_i32 = arith.constant 0 : i32
    %c0_i32_0 = arith.constant 0 : i32
    %c0_i32_1 = arith.constant 0 : i32
    %c0_i32_2 = arith.constant 0 : i32
    return %c0_i32, %c0_i32_0, %c0_i32_1 : i32, i32, i32
  }
  func.func @transform_8(%arg0: i32, %arg1: i32) -> (i32, i32, i32) {
    %c0_i32 = arith.constant 0 : i32
    %c0_i32_0 = arith.constant 0 : i32
    %c0_i32_1 = arith.constant 0 : i32
    %c0_i32_2 = arith.constant 0 : i32
    return %c0_i32, %c0_i32_0, %c0_i32_1 : i32, i32, i32
  }
  func.func @transform_9(%arg0: i32, %arg1: i32) -> (i32, i32) {
    %c0_i32 = arith.constant 0 : i32
    %c0_i32_0 = arith.constant 0 : i32
    %c0_i32_1 = arith.constant 0 : i32
    return %c0_i32, %c0_i32_0 : i32, i32
  }
  func.func @transform_10(%arg0: i32, %arg1: i32) -> (i32, i32) {
    %c0_i32 = arith.constant 0 : i32
    %c0_i32_0 = arith.constant 0 : i32
    %c0_i32_1 = arith.constant 0 : i32
    return %c0_i32, %c0_i32_0 : i32, i32
  }
  func.func @transform_11(%arg0: i32, %arg1: i32) -> (i32, i32, i32, i32) {
    %c0_i32 = arith.constant 0 : i32
    %c0_i32_0 = arith.constant 0 : i32
    %c0_i32_1 = arith.constant 0 : i32
    return %arg0, %arg1, %c0_i32, %c0_i32_0 : i32, i32, i32, i32
  }
}

</mosaic_0001>

<bundles_post_ra>
// kernel: time_local_decoder_forward.1
= control target key start
LH: loop header
LB: loop body
LE: loop exit
PB: predicated region body
PF: predicated region fallthrough
CT: control target
= control target key end

     0   :  { %s2642_s19 = smov 0   ;;  %s2644_s20 = smov 0   ;;  %s3615_s0 = inlined_call_operand.vmem [shape: f32[2,2,3,512], index: 0, kind: input, shape index: {}]   ;;  %s3616_s1 = inlined_call_operand.vmem [shape: bf16[2,2,32,512], index: 1, kind: input, shape index: {}]   ;;  %s3617_s2 = inlined_call_operand.vmem [shape: f32[2,96,1], index: 2, kind: input, shape index: {}]   ;;  %s3618_s3 = inlined_call_operand.vmem [shape: f32[32,3], index: 3, kind: input, shape index: {}]   ;;  %s3619_s4 = inlined_call_operand.vmem [shape: bf16[96,32], index: 4, kind: input, shape index: {}]   ;;  %s3620_s5 = inlined_call_operand.vmem [shape: bf16[3,32,32], index: 5, kind: input, shape index: {}]   ;;  %s3621_s6 = inlined_call_operand.vmem [shape: f32[3,32,1], index: 6, kind: input, shape index: {}]   ;;  %s3622_s7 = inlined_call_operand.vmem [shape: bf16[3,32,32], index: 7, kind: input, shape index: {}]   ;;  %s3623_s8 = inlined_call_operand.vmem [shape: f32[3,32,1], index: 8, kind: input, shape index: {}]   ;;  %s3624_s9 = inlined_call_operand.vmem [shape: f32[32,1], index: 9, kind: input, shape index: {}]   ;;  %s3625_s10 = inlined_call_operand.<no memory space> [shape: f32[1,1], index: 10, kind: input, shape index: {}]   ;;  %s3626_s11 = inlined_call_operand.vmem [shape: f32[2,2,1,512], index: 11, kind: output, shape index: {}]  }
   0x1   :  { %v16_v0 = vstv %s3625_s10  ;;  %s2646_s21 = smov 0  }
   0x2   :  { %17 = vst [vmem:[#allocation2] sm:$0x1] %v16_v0 }
   0x3 LB: > { %s35_s10 = sadd.s32 1, %s2566_s20  ;;  %p2245_p0 = scmp.ge.s32.totalorder %s2570_s21, 1  ;;  %s2570_s21 = sphi %s2646_s21, %s23_s21   ;;  %s2566_s20 = sphi %s2644_s20, %s3734_s20   ;;  %s2562_s19 = sphi %s2642_s19, %s3733_s19  }
   0x4   : > { %p37_p1 = scmp.ge.s32.totalorder %s35_s10, 2  ;;  %p389_p2 = scmp.lt.s32.totalorder %s2570_s21, 3 }
   0x6   : > { %s3736_s10 = smov (%p37_p1, %s35_s10), 0  ;;  %p390_p3 = pnand %p2245_p0, %p389_p2 }
   0x7   : > { %p454_p4 = scmp.lt.s32.totalorder (!%p390_p3), %s2562_s19, 1  ;;  %s2804_s14 = smov (!%p390_p3), 0  }
   0x8   : > { %393 = sbr.rel (%p390_p3) target bundleno = 1272 (0x4f8), region = 64 }
   0xd   : > { %v2663_v1 = vld [vmem:[%s3619_s4] sm:$0xf]  ;;  %v2668_v2 = vld [vmem:[%s3619_s4] sm:$0xf0]  ;;  %v2678_v4 = vld [vmem:[%s3619_s4 + $0x8] sm:$0xf] }
   0xe   : > { %3631 = vst [vmem:[#allocation3_spill] sm:$0xff] %v2663_v1  ;;  %v2673_v3 = vld [vmem:[%s3618_s3] sm:$0xff]  ;;  %v2683_v5 = vld [vmem:[%s3619_s4 + $0x8] sm:$0xf0]  ;;  %v2688_v6 = vld [vmem:[%s3619_s4 + $0x10] sm:$0xf] }
   0xf   : > { %3632 = vst [vmem:[#allocation4_spill] sm:$0xff] %v2668_v2  ;;  %s3738_s19 = smov (!%p454_p4, %s2562_s19), 1  ;;  %v2693_v7 = vld [vmem:[%s3619_s4 + $0x10] sm:$0xf0]  ;;  %v2698_v8 = vld [vmem:[%s3619_s4 + $0x18] sm:$0xf] }
  0x10   : > { %3633 = vst [vmem:[#allocation5_spill] sm:$0xff] %v2673_v3  ;;  %v2703_v9 = vld [vmem:[%s3618_s3 + $0x8] sm:$0xff]  ;;  %v2708_v10 = vld [vmem:[%s3619_s4 + $0x18] sm:$0xf0]  ;;  %v2713_v11 = vld [vmem:[%s3619_s4 + $0x20] sm:$0xf] }
  0x11   : > { %3634 = vst [vmem:[#allocation6_spill] sm:$0xff] %v2678_v4  ;;  %v2718_v12 = vld [vmem:[%s3619_s4 + $0x20] sm:$0xf0]  ;;  %s2466_s30 = sshll.u32 %s3738_s19, 5  ;;  %s2467_s12 = sshll.u32 %s3738_s19, 7  ;;  %v2743_v15 = vld [vmem:[%s3618_s3 + $0x10] sm:$0xff] }
  0x12   : > { %3635 = vst [vmem:[#allocation7_spill] sm:$0xff] %v2683_v5  ;;  %v2723_v13 = vld [vmem:[%s3619_s4 + $0x28] sm:$0xf]  ;;  %v2728_v14 = vld [vmem:[%s3619_s4 + $0x28] sm:$0xf0]  ;;  %s2733_s22 = scalar_lea.vmem %s3615_s0, %s2466_s30  ;;  %s2738_s25 = scalar_lea.vmem %s3616_s1, %s2467_s12  ;;  %v2748_v16 = vld [vmem:[%s3618_s3 + $0x18] sm:$0xff] }
  0x13   : > { %3636 = vst [vmem:[#allocation8_spill] sm:$0xff] %v2688_v6  ;;  %v2753_v17 = vld [vmem:[%s3624_s9] sm:$0xff]  ;;  %s2496_s30 = smul.u32 96, %s3738_s19  ;;  %s2251_s15 = sshll.u32 %s3738_s19, 3  ;;  %v2758_v18 = vld [vmem:[%s3624_s9 + $0x8] sm:$0xff]  ;;  %v2763_v19 = vld [vmem:[%s3624_s9 + $0x10] sm:$0xff] }
  0x14   : > { %3637 = vst [vmem:[#allocation9_spill] sm:$0xff] %v2693_v7  ;;  %v2768_v20 = vld [vmem:[%s3624_s9 + $0x18] sm:$0xff]  ;;  %s2773_s28 = scalar_lea.vmem %s3626_s11, %s2251_s15  ;;  %v2775_v21 = vld [vmem:[#allocation2] sm:$0x1] }
  0x15   : > { %3638 = vst [vmem:[#allocation10_spill] sm:$0xff] %v2698_v8  ;;  %s479_s13 = scalar_lea.vmem %s3617_s2, %s2496_s30 }
  0x16   : > { %3639 = vst [vmem:[#allocation11_spill] sm:$0xff] %v2703_v9  ;;  %v2780_v22 = vld [vmem:[%s479_s13] sm:$0xff]  ;;  %v2782_v23 = vld [vmem:[%s479_s13 + $0x8] sm:$0xff]  ;;  %v2784_v24 = vld [vmem:[%s479_s13 + $0x10] sm:$0xff] }
  0x17   : > { %3640 = vst [vmem:[#allocation12_spill] sm:$0xff] %v2708_v10  ;;  %v2786_v25 = vld [vmem:[%s479_s13 + $0x18] sm:$0xff]  ;;  %v2788_v26 = vld [vmem:[%s479_s13 + $0x20] sm:$0xff]  ;;  %v2790_v27 = vld [vmem:[%s479_s13 + $0x28] sm:$0xff] }
  0x18   : > { %3641 = vst [vmem:[#allocation13_spill] sm:$0xff] %v2713_v11  ;;  %v2792_v28 = vld [vmem:[%s479_s13 + $0x30] sm:$0xff]  ;;  %v2794_v29 = vld [vmem:[%s479_s13 + $0x38] sm:$0xff]  ;;  %v2796_v30 = vld [vmem:[%s479_s13 + $0x40] sm:$0xff] }
  0x19   : > { %3642 = vst [vmem:[#allocation14_spill] sm:$0xff] %v2718_v12  ;;  %v2798_v31 = vld [vmem:[%s479_s13 + $0x48] sm:$0xff]  ;;  %v2800_v32 = vld [vmem:[%s479_s13 + $0x50] sm:$0xff]  ;;  %v2802_v33 = vld [vmem:[%s479_s13 + $0x58] sm:$0xff] }
  0x1a   : > { %3643 = vst [vmem:[#allocation15_spill] sm:$0xff] %v2723_v13 }
  0x1b   : > { %3644 = vst [vmem:[#allocation16_spill] sm:$0xff] %v2728_v14 }
  0x1c   : > { %3645 = vst [vmem:[#allocation17_spill] sm:$0xff] %v2743_v15 }
  0x1d   : > { %3646 = vst [vmem:[#allocation18_spill] sm:$0xff] %v2748_v16 }
  0x1e   : > { %3647 = vst [vmem:[#allocation19_spill] sm:$0xff] %v2753_v17 }
  0x1f   : > { %3648 = vst [vmem:[#allocation20_spill] sm:$0xff] %v2758_v18 }
  0x20   : > { %3649 = vst [vmem:[#allocation21_spill] sm:$0xff] %v2763_v19 }
  0x21   : > { %3650 = vst [vmem:[#allocation22_spill] sm:$0xff] %v2768_v20 }
  0x22   : > { %3651 = vst [vmem:[#allocation23_spill] sm:$0xff] %v2775_v21 }
  0x23   : > { %3652 = vst [vmem:[#allocation24_spill] sm:$0xff] %v2780_v22 }
  0x24   : > { %3653 = vst [vmem:[#allocation25_spill] sm:$0xff] %v2782_v23 }
  0x25   : > { %3654 = vst [vmem:[#allocation26_spill] sm:$0xff] %v2784_v24 }
  0x26   : > { %3655 = vst [vmem:[#allocation27_spill] sm:$0xff] %v2786_v25 }
  0x27   : > { %3656 = vst [vmem:[#allocation28_spill] sm:$0xff] %v2788_v26 }
  0x28   : > { %3657 = vst [vmem:[#allocation29_spill] sm:$0xff] %v2790_v27 }
  0x29   : > { %3658 = vst [vmem:[#allocation30_spill] sm:$0xff] %v2792_v28 }
  0x2a   : > { %3659 = vst [vmem:[#allocation31_spill] sm:$0xff] %v2794_v29 }
  0x2b   : > { %3660 = vst [vmem:[#allocation32_spill] sm:$0xff] %v2796_v30 }
  0x2c   : > { %3661 = vst [vmem:[#allocation33_spill] sm:$0xff] %v2798_v31 }
  0x2d   : > { %3662 = vst [vmem:[#allocation34_spill] sm:$0xff] %v2800_v32 }
  0x2e   : > { %3663 = vst [vmem:[#allocation35_spill] sm:$0xff] %v2802_v33 }
  0x2f LB: >> { %v3664_v16 = vld [vmem:[#allocation18_spill] sm:$0xff]  ;;  %v3665_v15 = vld [vmem:[#allocation17_spill] sm:$0xff]  ;;  %v3666_v9 = vld [vmem:[#allocation11_spill] sm:$0xff]  ;;  %v2576_v34 = vmov 2   ;;  %v2577_v35 = vmov 1   ;;  %v2578_v36 = vmov 0   ;;  %s2574_s14 = sphi %s2804_s14, %s529_s14  }
  0x30   : >> { %v3667_v3 = vld [vmem:[#allocation5_spill] sm:$0xff]  ;;  %2534 = vset.pattern.permute.xlu2 %v2576_v34  ;;  %2533 = vset.pattern.permute.xlu1 %v2577_v35  ;;  %s2474_s30 = sshll.u32 %s2574_s14, 6  ;;  %v3668_v1 = vld [vmem:[#allocation3_spill] sm:$0xff]  ;;  %v3669_v2 = vld [vmem:[#allocation4_spill] sm:$0xff]  ;;  %vm671_vm0 = vcmask 261120   ;;  %s2483_s19 = sshll.u32 %s2574_s14, 4 }
  0x31   : >> { %2532 = vset.pattern.permute.xlu0 %v2578_v36  ;;  %970 = vperm.xlu2 %2534, %v3665_v15   ;;  %s532_s15 = scalar_lea.vmem %s2738_s25, %s2474_s30  ;;  %v2257_v61 = vor.u32 %v3669_v2, %v3668_v1  ;;  %v3670_v24 = vld [vmem:[#allocation26_spill] sm:$0xff]  ;;  %v3671_v25 = vld [vmem:[#allocation27_spill] sm:$0xff]  ;;  %v3674_v22 = vld [vmem:[#allocation24_spill] sm:$0xff]  ;;  %s848_s29 = scalar_lea.vmem %s2733_s22, %s2483_s19  ;;  %vm2094_vm1 = vcmask 1040384   ;;  %vm2096_vm2 = vcmask 1042434   ;;  %vm2098_vm3 = vcmask 1041408  }
  0x32   : >> { %910 = vperm.xlu1 %2533, %v3665_v15   ;;  %863 = vperm.xlu0 %2532, %v3665_v15   ;;  %v2296_v37 = vld [vmem:[%s532_s15 + $0x20] sm:$0xf]  ;;  %v2481_v38 = vld [vmem:[%s532_s15 + $0x2c] sm:$0xf0]  ;;  %v2479_v39 = vld [vmem:[%s532_s15 + $0x24] sm:$0xf] }
  0x33   : >> { %v2297_v40 = vor.u32 %v2481_v38, %v2296_v37  ;;  %v2298_v41 = vld [vmem:[%s532_s15 + $0x30] sm:$0xf0]  ;;  %v2304_v42 = vld [vmem:[%s532_s15 + $0x28] sm:$0xf]  ;;  %v2482_v43 = vld [vmem:[%s532_s15 + $0x34] sm:$0xf0] }
  0x34   : >> { %v2301_v44 = vor.u32 %v2479_v39, %v2298_v41  ;;  %v2305_v45 = vor.u32 %v2482_v43, %v2304_v42  ;;  %v2480_v46 = vld [vmem:[%s532_s15 + $0x2c] sm:$0xf]  ;;  %v2306_v47 = vld [vmem:[%s532_s15 + $0x38] sm:$0xf0]  ;;  %v2280_v48 = vld [vmem:[%s532_s15] sm:$0xf] }
  0x35   : >> { %696 = vmatpush.bf16.msra.mxu0 %v2297_v40  ;;  %v2309_v49 = vor.u32 %v2480_v46, %v2306_v47  ;;  %v2477_v50 = vld [vmem:[%s532_s15 + $0xc] sm:$0xf0]  ;;  %v2475_v51 = vld [vmem:[%s532_s15 + $0x4] sm:$0xf]  ;;  %v2282_v52 = vld [vmem:[%s532_s15 + $0x10] sm:$0xf0] }
  0x36   : >> { %735 = vmatpush.bf16.msra.mxu1 %v2301_v44  ;;  %774 = vmatpush.bf16.msra.mxu2 %v2305_v45  ;;  %v2281_v53 = vor.u32 %v2477_v50, %v2280_v48  ;;  %v2285_v54 = vor.u32 %v2475_v51, %v2282_v52  ;;  %v2288_v55 = vld [vmem:[%s532_s15 + $0x8] sm:$0xf]  ;;  %v2478_v56 = vld [vmem:[%s532_s15 + $0x14] sm:$0xf0]  ;;  %v2476_v57 = vld [vmem:[%s532_s15 + $0xc] sm:$0xf] }
  0x37   : >> { %813 = vmatpush.bf16.msra.mxu3 %v2309_v49  ;;  %v2289_v58 = vor.u32 %v2478_v56, %v2288_v55  ;;  %v2290_v59 = vld [vmem:[%s532_s15 + $0x18] sm:$0xf0]  ;;  %v3673_v5 = vld [vmem:[#allocation7_spill] sm:$0xff]  ;;  %v1067_v63 = vld [vmem:[%s3621_s6 + $0x10] sm:$0xff] }
  0x38   : >> { %v2293_v60 = vor.u32 %v2476_v57, %v2290_v59  ;;  %v3672_v4 = vld [vmem:[#allocation6_spill] sm:$0xff]  ;;  %v3675_v6 = vld [vmem:[#allocation8_spill] sm:$0xff]  ;;  %v3676_v7 = vld [vmem:[#allocation9_spill] sm:$0xff] }
  0x39   : >> { %974 = vperm.xlu2 %2534, %v3664_v16   ;;  %697 = vmatpush.bf16.msra.mxu0 %v2281_v53  ;;  %v2261_v62 = vor.u32 %v3673_v5, %v3672_v4  ;;  %v2265_v0 = vor.u32 %v3676_v7, %v3675_v6  ;;  %v3677_v23 = vld [vmem:[#allocation25_spill] sm:$0xff]  ;;  %v3678_v8 = vld [vmem:[#allocation10_spill] sm:$0xff]  ;;  %v3679_v10 = vld [vmem:[#allocation12_spill] sm:$0xff] }
  0x3a   : >> { %914 = vperm.xlu1 %2533, %v3664_v16   ;;  %868 = vperm.xlu0 %2532, %v3664_v16   ;;  %v2269_v37 = vor.u32 %v3679_v10, %v3678_v8  ;;  %v1211_v38 = vld [vmem:[%s3623_s8 + $0x10] sm:$0xff]  ;;  %v1209_v39 = vld [vmem:[%s3623_s8] sm:$0xff]  ;;  %v2375_v42 = vld [vmem:[%s3621_s6 + $0x38] sm:$0xff] }
  0x3b   : >> { %736 = vmatpush.bf16.msra.mxu1 %v2285_v54  ;;  %775 = vmatpush.bf16.msra.mxu2 %v2289_v58  ;;  %v3680_v29 = vld [vmem:[#allocation31_spill] sm:$0xff]  ;;  %v3681_v11 = vld [vmem:[#allocation13_spill] sm:$0xff]  ;;  %v3682_v12 = vld [vmem:[#allocation14_spill] sm:$0xff] }
  0x3c   : >> { %814 = vmatpush.bf16.msra.mxu3 %v2293_v60  ;;  %2310 = vmatmul.msk.bf16.vlgmr.msra.gmra.mxu0 %vm671_vm0, %v2257_v61  ;;  %v2273_v40 = vor.u32 %v3682_v12, %v3681_v11  ;;  %v3683_v27 = vld [vmem:[#allocation29_spill] sm:$0xff]  ;;  %v3684_v26 = vld [vmem:[#allocation28_spill] sm:$0xff]  ;;  %v2372_v41 = vld [vmem:[%s3621_s6 + $0x20] sm:$0xff] }
  0x3d   : >> { %v2399_v43 = vld [vmem:[%s3623_s8 + $0x38] sm:$0xff]  ;;  %v3685_v13 = vld [vmem:[#allocation15_spill] sm:$0xff]  ;;  %v3686_v14 = vld [vmem:[#allocation16_spill] sm:$0xff] }
  0x3e   : >> { %2316 = vmatmul.msk.bf16.vlgmr.msra.gmra.mxu1 %vm671_vm0, %v2257_v61  ;;  %2322 = vmatmul.msk.bf16.vlgmr.msra.gmra.mxu2 %vm671_vm0, %v2257_v61  ;;  %v2277_v44 = vor.u32 %v3686_v14, %v3685_v13  ;;  %v2398_v45 = vld [vmem:[%s3623_s8 + $0x30] sm:$0xff]  ;;  %v2396_v46 = vld [vmem:[%s3623_s8 + $0x20] sm:$0xff]  ;;  %v1068_v47 = vld [vmem:[%s3621_s6 + $0x18] sm:$0xff] }
  0x3f   : >> { %2328 = vmatmul.msk.bf16.vlgmr.msra.gmra.mxu3 %vm671_vm0, %v2257_v61  ;;  %v3687_v33 = vld [vmem:[#allocation35_spill] sm:$0xff]  ;;  %v3688_v31 = vld [vmem:[#allocation33_spill] sm:$0xff]  ;;  %v3689_v30 = vld [vmem:[#allocation32_spill] sm:$0xff] }
  0x40   : >> { %v2420_v48 = vld [vmem:[%s3621_s6 + $0x40] sm:$0xff]  ;;  %v2423_v50 = vld [vmem:[%s3621_s6 + $0x58] sm:$0xff]  ;;  %v2445_v53 = vld [vmem:[%s3623_s8 + $0x48] sm:$0xff] }
  0x41   : >> { %2536 = vset.pattern.permute.xlu2 %v2578_v36  ;;  %v3690_v28 = vld [vmem:[#allocation30_spill] sm:$0xff]  ;;  %v1210_v55 = vld [vmem:[%s3623_s8 + $0x8] sm:$0xff]  ;;  %v2374_v60 = vld [vmem:[%s3621_s6 + $0x30] sm:$0xff] }
  0x42   : >> { %2535 = vset.pattern.permute.xlu1 %v2578_v36  ;;  %553 = vperm.xlu0 %2532, %v3670_v24   ;;  %v2444_v54 = vld [vmem:[%s3623_s8 + $0x40] sm:$0xff]  ;;  %v2447_v59 = vld [vmem:[%s3623_s8 + $0x58] sm:$0xff] }
  0x43   : >> { %853 = vperm.xlu2 %2536, %v3667_v3   ;;  %558 = vperm.xlu1 %2535, %v3671_v25   ;;  %v3691_v17 = vld [vmem:[#allocation19_spill] sm:$0xff]  ;;  %v3692_v20 = vld [vmem:[#allocation22_spill] sm:$0xff]  ;;  %v3693_v19 = vld [vmem:[#allocation21_spill] sm:$0xff] }
  0x44   : >> { %v3694_v32 = vld [vmem:[#allocation34_spill] sm:$0xff] }
  0x4a   : >> { %858 = vperm.xlu0 %2532, %v3666_v9  }
  0x4b   : >> { %2538 = vset.pattern.permute.xlu2 %v2577_v35  ;;  %2537 = vset.pattern.permute.xlu1 %v2577_v35  ;;  %v1065_v35 = vld [vmem:[%s3621_s6] sm:$0xff] }
  0x4c   : >> { %906 = vperm.xlu2 %2538, %v3666_v9   ;;  %902 = vperm.xlu1 %2537, %v3667_v3  }
  0x4d   : >> { %2311 = vmatmul.msk.bf16.gmra.mxu0 %vm671_vm0, %v2261_v62 }
  0x4e   : >> { %2317 = vmatmul.msk.bf16.gmra.mxu1 %vm671_vm0, %v2261_v62  ;;  %2323 = vmatmul.msk.bf16.gmra.mxu2 %vm671_vm0, %v2261_v62 }
  0x4f   : >> { %2329 = vmatmul.msk.bf16.gmra.mxu3 %vm671_vm0, %v2261_v62  ;;  %v849_v62 = vld [vmem:[%s848_s29] sm:$0x77] }
  0x52   : >> { %2539 = vset.pattern.permute.xlu0 %v2576_v34 }
  0x53   : >> { %962 = vperm.xlu0 %2539, %v3667_v3  }
  0x54   : >> { %2541 = vset.pattern.permute.xlu2 %v2578_v36  ;;  %2540 = vset.pattern.permute.xlu1 %v2576_v34  ;;  %v1066_v34 = vld [vmem:[%s3621_s6 + $0x8] sm:$0xff] }
  0x55   : >> { %543 = vperm.xlu2 %2541, %v3674_v22   ;;  %966 = vperm.xlu1 %2540, %v3666_v9  }
  0x5b   : >> { %2543 = vset.pattern.permute.xlu0 %v2578_v36 }
  0x5c   : >> { %1086 = vperm.xlu0 %2543, %v1068_v47  }
  0x5d   : >> { %1081 = vperm.xlu2 %2541, %v1067_v63   ;;  %2542 = vset.pattern.permute.xlu1 %v2578_v36  ;;  %v1212_v36 = vld [vmem:[%s3623_s8 + $0x18] sm:$0xff]  ;;  %v850_v63 = vld [vmem:[%s848_s29 + $0x8] sm:$0x77]  ;;  %s2334_s29 = sshll.u32 %s2574_s14, 2  ;;  %s529_s14 = sadd.s32 1, %s2574_s14  }
  0x5e   : >> { %548 = vperm.xlu1 %2542, %v3677_v23   ;;  %2312 = vmatmul.msk.bf16.gmra.mxu0 %vm671_vm0, %v2265_v0  ;;  %s2101_s13 = scalar_lea.vmem %s2773_s28, %s2334_s29  ;;  %p526_p5 = scmp.ge.s32.totalorder %s529_s14, 2  }
  0x5f   : >> { %2318 = vmatmul.msk.bf16.gmra.mxu1 %vm671_vm0, %v2265_v0  ;;  %2324 = vmatmul.msk.bf16.gmra.mxu2 %vm671_vm0, %v2265_v0 }
  0x60   : >> { %2330 = vmatmul.msk.bf16.gmra.mxu3 %vm671_vm0, %v2265_v0  ;;  %v977_v0 = vperm.slane %v849_v62, 2 }
  0x62   : >> { %v2955_v47 = vperm.slane %v977_v0, 2 }
  0x64   : >> { %573 = vperm.xlu0 %2543, %v3690_v28  }
  0x65   : >> { %1076 = vperm.xlu2 %2541, %v1066_v34   ;;  %v978_v34 = vperm.slane %v849_v62, 6 }
  0x66   : >> { %1071 = vperm.xlu1 %2542, %v1065_v35  }
  0x6c   : >> { %1220 = vperm.xlu0 %2543, %v1210_v55  }
  0x6d   : >> { %1230 = vperm.xlu2 %2541, %v1212_v36  }
  0x6e   : >> { %1225 = vperm.xlu1 %2542, %v1211_v38   ;;  %2313 = vmatmul.msk.bf16.gmra.mxu0 %vm671_vm0, %v2269_v37  ;;  %v980_v38 = vperm.slane %v850_v63, 6 }
  0x6f   : >> { %2319 = vmatmul.msk.bf16.gmra.mxu1 %vm671_vm0, %v2269_v37  ;;  %2325 = vmatmul.msk.bf16.gmra.mxu2 %vm671_vm0, %v2269_v37 }
  0x70   : >> { %2331 = vmatmul.msk.bf16.gmra.mxu3 %vm671_vm0, %v2269_v37  ;;  %v979_v37 = vperm.slane %v850_v63, 2 }
  0x72   : >> { %v2966_v55 = vperm.slane %v979_v37, 2 }
  0x74   : >> { %1403 = vperm.xlu0 %2543, %v2374_v60  }
  0x75   : >> { %1215 = vperm.xlu2 %2541, %v1209_v39   ;;  %v873_v39 = vperm.slane %v849_v62, 0 }
  0x76   : >> { %578 = vperm.xlu1 %2542, %v3680_v29  }
  0x77   : >> { %v2970_v60 = vperm.slane %v873_v39, 0 }
  0x7d   : >> { %568 = vperm.xlu2 %2541, %v3683_v27  }
  0x7e   : >> { %563 = vperm.xlu1 %2542, %v3684_v26   ;;  %2314 = vmatmul.msk.bf16.gmra.mxu0 %vm671_vm0, %v2273_v40 }
  0x7f   : >> { %2320 = vmatmul.msk.bf16.gmra.mxu1 %vm671_vm0, %v2273_v40  ;;  %2326 = vmatmul.msk.bf16.gmra.mxu2 %vm671_vm0, %v2273_v40 }
  0x80   : >> { %2332 = vmatmul.msk.bf16.gmra.mxu3 %vm671_vm0, %v2273_v40  ;;  %v874_v40 = vperm.slane %v849_v62, 4 }
  0x85   : >> { %1393 = vperm.xlu2 %2541, %v2372_v41   ;;  %v875_v41 = vperm.slane %v850_v63, 0 }
  0x86   : >> { %1408 = vperm.xlu1 %2542, %v2375_v42   ;;  %v876_v42 = vperm.slane %v850_v63, 4 }
  0x88   : >> { %v2976_v0 = vperm.slane %v876_v42, 0 }
  0x8b   : >> { %v971_v49 = vpop.permute.xlu2 %970 }
  0x8d   : >> { %1554 = vperm.xlu2 %2541, %v2399_v43   ;;  %v917_v43 = vperm.slane %v849_v62, 1 }
  0x8e   : >> { %1549 = vperm.xlu1 %2542, %v2398_v45   ;;  %2315 = vmatmul.msk.bf16.gmra.mxu0 %vm671_vm0, %v2277_v44  ;;  %v919_v45 = vperm.slane %v850_v63, 1 }
  0x8f   : >> { %2321 = vmatmul.msk.bf16.gmra.mxu1 %vm671_vm0, %v2277_v44  ;;  %2327 = vmatmul.msk.bf16.gmra.mxu2 %vm671_vm0, %v2277_v44 }
  0x90   : >> { %2333 = vmatmul.msk.bf16.gmra.mxu3 %vm671_vm0, %v2277_v44  ;;  %v918_v44 = vperm.slane %v849_v62, 5  ;;  %v2972_v62 = vperm.slane %v874_v40, 0  ;;  %v2979_v2 = vperm.slane %v919_v45, 1  ;;  %v999_v40 = vmul.f32 %v2966_v55, %v971_v49 }
  0x92   : >> { %v926_v1 = vperm.slane %v918_v44, 1 }
  0x93   : >> { %v2936_v57 = vpop.permute.xlu2 %974 }
  0x94   : >> { %v1001_v42 = vmul.f32 %v2955_v47, %v2936_v57 }
  0x95   : >> { %1539 = vperm.xlu2 %2541, %v2396_v46   ;;  %v920_v46 = vperm.slane %v850_v63, 5  ;;  %v2974_v63 = vperm.slane %v875_v41, 0 }
  0x96   : >> { %598 = vperm.xlu1 %2542, %v3687_v33  }
  0x97   : >> { %v2981_v3 = vperm.slane %v920_v46, 1 }
  0x9d   : >> { %588 = vperm.xlu2 %2541, %v3688_v31   ;;  %v2951_v35 = vpop.permute.xlu2 %853 }
  0x9e   : >> { %583 = vperm.xlu1 %2542, %v3689_v30   ;;  %v885_v23 = vmul.f32 %v2970_v60, %v2951_v35  ;;  %v888_v28 = vmul.f32 %v2976_v0, %v2951_v35 }
  0xa4   : >> { %v2920_v51 = vpop.permute.xlu0 %863  ;;  %v2922_v52 = vpop.permute.xlu1 %910 }
  0xa5   : >> { %1717 = vperm.xlu2 %2541, %v2420_v48   ;;  %v2957_v48 = vperm.slane %v978_v34, 2  ;;  %v925_v34 = vperm.slane %v917_v43, 1  ;;  %v893_v44 = vmul.f32 %v2970_v60, %v2920_v51  ;;  %v894_v45 = vmul.f32 %v2972_v62, %v2920_v51 }
  0xa6   : >> { %1732 = vperm.xlu1 %2542, %v2423_v50   ;;  %v895_v46 = vmul.f32 %v2974_v63, %v2920_v51  ;;  %v907_v4 = vpop.permute.xlu2 %906  ;;  %v938_v6 = vmul.f32 %v926_v1, %v2922_v52  ;;  %v939_v7 = vmul.f32 %v2979_v2, %v2922_v52  ;;  %v940_v8 = vmul.f32 %v2981_v3, %v2922_v52 }
  0xa7   : >> { %v998_v39 = vmul.f32 %v2957_v48, %v971_v49  ;;  %v1002_v43 = vmul.f32 %v2957_v48, %v2936_v57  ;;  %v937_v5 = vmul.f32 %v925_v34, %v2922_v52  ;;  %v935_v18 = vmul.f32 %v2979_v2, %v907_v4 }
  0xa8   : >> { %v954_v25 = vadd.f32 %v938_v6, %v894_v45  ;;  %v955_v26 = vadd.f32 %v939_v7, %v895_v46 }
  0xa9   : >> { %v953_v24 = vadd.f32 %v937_v5, %v893_v44  ;;  %v936_v5 = vmul.f32 %v2981_v3, %v907_v4 }
  0xaa   : >> { %v1014_v45 = vadd.f32 %v998_v39, %v954_v25 }
  0xac   : >> { %v2934_v56 = vpop.permute.xlu1 %914  ;;  %v2938_v58 = vpop.permute.xlu0 %868 }
  0xad   : >> { %1868 = vperm.xlu2 %2541, %v2445_v53   ;;  %v898_v11 = vmul.f32 %v2972_v62, %v2938_v58  ;;  %v941_v12 = vmul.f32 %v925_v34, %v2934_v56  ;;  %v942_v13 = vmul.f32 %v926_v1, %v2934_v56  ;;  %v899_v52 = vmul.f32 %v2974_v63, %v2938_v58 }
  0xae   : >> { %1863 = vperm.xlu1 %2542, %v2444_v54   ;;  %v2373_v54 = vld [vmem:[%s3621_s6 + $0x28] sm:$0xff]  ;;  %v900_v16 = vmul.f32 %v2976_v0, %v2938_v58 }
  0xaf   : >> { %1398 = vperm.xlu0 %2543, %v2373_v54   ;;  %v896_v54 = vmul.f32 %v2976_v0, %v2920_v51  ;;  %v897_v51 = vmul.f32 %v2970_v60, %v2938_v58  ;;  %v886_v58 = vmul.f32 %v2972_v62, %v2951_v35  ;;  %v958_v31 = vadd.f32 %v942_v13, %v898_v11 }
  0xb1   : >> { %v956_v27 = vadd.f32 %v940_v8, %v896_v54  ;;  %v957_v30 = vadd.f32 %v941_v12, %v897_v51  ;;  %v3053_v12 = vadd.f32 %v999_v40, %v955_v26 }
  0xb4   : >> { %v2953_v36 = vpop.permute.xlu0 %553 }
  0xb5   : >> { %2007 = vperm.xlu2 %2541, %v3691_v17   ;;  %v2949_v61 = vpop.permute.xlu1 %558  ;;  %v943_v17 = vmul.f32 %v2979_v2, %v2934_v56 }
  0xb6   : >> { %1878 = vperm.xlu1 %2542, %v2447_v59   ;;  %v2968_v59 = vperm.slane %v980_v38, 2  ;;  %v997_v38 = vmul.f32 %v2955_v47, %v971_v49 }
  0xb7   : >> { %593 = vperm.xlu0 %2543, %v3694_v32   ;;  %v934_v32 = vmul.f32 %v926_v1, %v907_v4  ;;  %v959_v33 = vadd.f32 %v943_v17, %v899_v52 }
  0xb8   : >> { %v1000_v41 = vmul.f32 %v2968_v59, %v971_v49  ;;  %v1004_v22 = vmul.f32 %v2968_v59, %v2936_v57 }
  0xb9   : >> { %v2959_v50 = vpop.f32.mrf.mxu0 }
  0xba   : >> { %v3055_v11 = vadd.f32 %v1000_v41, %v956_v27 }
  0xbb   : >> { %v2961_v53 = vpop.f32.mrf.mxu1 }
  0xbc   : >> { %v3002_v49 = vpop.permute.xlu0 %858 }
  0xbd   : >> { %2022 = vperm.xlu2 %2541, %v3692_v20   ;;  %v1003_v20 = vmul.f32 %v2966_v55, %v2936_v57  ;;  %v933_v57 = vmul.f32 %v925_v34, %v907_v4  ;;  %v889_v13 = vmul.f32 %v2970_v60, %v3002_v49  ;;  %v890_v4 = vmul.f32 %v2972_v62, %v3002_v49  ;;  %v3072_v62 = vpop.permute.xlu2 %543 }
  0xbe   : >> { %2017 = vperm.xlu1 %2542, %v3693_v19   ;;  %v2984_v37 = vpop.permute.xlu1 %902  ;;  %v944_v19 = vmul.f32 %v2981_v3, %v2934_v56  ;;  %v887_v56 = vmul.f32 %v2974_v63, %v2951_v35  ;;  %v1013_v35 = vadd.f32 %v997_v38, %v953_v24 }
  0xbf   : >> { %v929_v6 = vmul.f32 %v925_v34, %v2984_v37  ;;  %v930_v7 = vmul.f32 %v926_v1, %v2984_v37  ;;  %v1018_v1 = vadd.f32 %v1002_v43, %v958_v31  ;;  %v2397_v34 = vld [vmem:[%s3623_s8 + $0x28] sm:$0xff]  ;;  %v931_v24 = vmul.f32 %v2979_v2, %v2984_v37 }
  0xc0   : >> { %v960_v21 = vadd.f32 %v944_v19, %v900_v16  ;;  %v1017_v19 = vadd.f32 %v1001_v42, %v957_v30  ;;  %v932_v25 = vmul.f32 %v2981_v3, %v2984_v37  ;;  %v3068_v27 = vadd.f32 %v1003_v20, %v959_v33  ;;  %1544 = vperm.xlu0 %2543, %v2397_v34  }
  0xc1   : >> { %v3010_v9 = vpop.f32.mrf.mxu2  ;;  %v3020_v14 = vpop.f32.mrf.mxu0  ;;  %v945_v30 = vadd.f32 %v929_v6, %v885_v23  ;;  %v946_v31 = vadd.f32 %v930_v7, %v886_v58  ;;  %v700_v2 = vadd.f32 %v2959_v50, %v3072_v62  ;;  %v739_v3 = vadd.f32 %v2961_v53, %v3072_v62  ;;  %v2422_v7 = vld [vmem:[%s3621_s6 + $0x50] sm:$0xff] }
  0xc2   : >> { %v3012_v10 = vpop.f32.mrf.mxu3  ;;  %v3070_v60 = vadd.f32 %v1004_v22, %v960_v21  ;;  %v891_v20 = vmul.f32 %v2974_v63, %v3002_v49  ;;  %v892_v21 = vmul.f32 %v2976_v0, %v3002_v49  ;;  %v949_v22 = vadd.f32 %v933_v57, %v889_v13 }
  0xc3   : >> { %v3022_v15 = vpop.f32.mrf.mxu1  ;;  %v950_v33 = vadd.f32 %v934_v32, %v890_v4  ;;  %v947_v40 = vadd.f32 %v931_v24, %v887_v56  ;;  %v948_v41 = vadd.f32 %v932_v25, %v888_v28 }
  0xc4   : >> { %v951_v0 = vadd.f32 %v935_v18, %v891_v20  ;;  %v952_v49 = vadd.f32 %v936_v5, %v892_v21 }
  0xc5   : >> { %v963_v26 = vpop.permute.xlu0 %962 }
  0xc6   : >> { %v989_v38 = vmul.f32 %v2955_v47, %v963_v26  ;;  %v990_v39 = vmul.f32 %v2957_v48, %v963_v26  ;;  %v991_v53 = vmul.f32 %v2966_v55, %v963_v26  ;;  %v992_v63 = vmul.f32 %v2968_v59, %v963_v26 }
  0xc7   : >> { %v967_v29 = vpop.permute.xlu1 %966 }
  0xc8   : >> { %v993_v23 = vmul.f32 %v2955_v47, %v967_v29  ;;  %v994_v37 = vmul.f32 %v2957_v48, %v967_v29  ;;  %v1005_v46 = vadd.f32 %v989_v38, %v945_v30  ;;  %v1006_v54 = vadd.f32 %v990_v39, %v946_v31  ;;  %1727 = vperm.xlu0 %2543, %v2422_v7  }
  0xc9   : >> { %v3049_v8 = vpop.f32.mrf.mxu2  ;;  %v995_v28 = vmul.f32 %v2966_v55, %v967_v29  ;;  %v996_v52 = vmul.f32 %v2968_v59, %v967_v29  ;;  %v1007_v59 = vadd.f32 %v991_v53, %v947_v40  ;;  %v1008_v13 = vadd.f32 %v992_v63, %v948_v41  ;;  %v2421_v40 = vld [vmem:[%s3621_s6 + $0x48] sm:$0xff] }
  0xca   : >> { %v3051_v44 = vpop.f32.mrf.mxu3  ;;  %v704_v16 = vpop.f32.mrf.mxu0  ;;  %v1009_v57 = vadd.f32 %v993_v23, %v949_v22  ;;  %v1010_v6 = vadd.f32 %v994_v37, %v950_v33  ;;  %v3103_v55 = vadd.f32 %v1005_v46, %v700_v2  ;;  %v3105_v29 = vadd.f32 %v1006_v54, %v739_v3  ;;  %v2484_v46 = vld [vmem:[%s3620_s5] sm:$0xff] }
  0xcb   : >> { %v743_v17 = vpop.f32.mrf.mxu1  ;;  %v705_v42 = vadd.f32 %v704_v16, %v2953_v36  ;;  %v1011_v24 = vadd.f32 %v995_v28, %v951_v0  ;;  %v1012_v25 = vadd.f32 %v996_v52, %v952_v49  ;;  %v778_v41 = vadd.f32 %v3010_v9, %v3072_v62 }
  0xcc   : >> { %v744_v50 = vadd.f32 %v743_v17, %v2953_v36  ;;  %v1041_v39 = vmax.f32 %v3103_v55, 0.0  ;;  %v1042_v2 = vmax.f32 %v3105_v29, 0.0 }
  0xcd   : >> { %v3097_v18 = vadd.f32 %v1013_v35, %v705_v42  ;;  %v817_v42 = vadd.f32 %v3012_v10, %v3072_v62  ;;  %v3152_v63 = vadd.f32 %v1007_v59, %v778_v41 }
  0xce   : >> { %v3099_v5 = vadd.f32 %v1014_v45, %v744_v50 }
  0xcf   : >> { %v1049_v26 = vmax.f32 %v3097_v18, 0.0  ;;  %v3154_v9 = vadd.f32 %v1008_v13, %v817_v42 }
  0xd0   : >> { %v549_v43 = vpop.permute.xlu1 %548  ;;  %v1050_v31 = vmax.f32 %v3099_v5, 0.0  ;;  %1722 = vperm.xlu0 %2543, %v2421_v40  }
  0xd1   : >> { %v702_v32 = vadd.f32 %v3020_v14, %v549_v43  ;;  %v741_v47 = vadd.f32 %v3022_v15, %v549_v43  ;;  %v782_v48 = vpop.f32.mrf.mxu2  ;;  %v819_v38 = vadd.f32 %v3051_v44, %v549_v43 }
  0xd2   : >> { %v821_v51 = vpop.f32.mrf.mxu3  ;;  %v706_v58 = vpop.f32.mrf.mxu0  ;;  %v783_v45 = vadd.f32 %v782_v48, %v2953_v36  ;;  %v1044_v48 = vmax.f32 %v3154_v9, 0.0 }
  0xd3   : >> { %v745_v56 = vpop.f32.mrf.mxu1  ;;  %v707_v14 = vadd.f32 %v706_v58, %v2949_v61  ;;  %v3111_v17 = vadd.f32 %v1009_v57, %v702_v32  ;;  %v3113_v35 = vadd.f32 %v1010_v6, %v741_v47  ;;  %v822_v34 = vadd.f32 %v821_v51, %v2953_v36  ;;  %v2446_v51 = vld [vmem:[%s3623_s8 + $0x50] sm:$0xff]  ;;  %v3696_v57 = vld [vmem:[#allocation23_spill] sm:$0xff] }
  0xd4   : >> { %v746_v15 = vadd.f32 %v745_v56, %v2949_v61  ;;  %v3128_v23 = vadd.f32 %v3053_v12, %v783_v45  ;;  %v1043_v47 = vmax.f32 %v3152_v63, 0.0  ;;  %v3695_v58 = vld [vmem:[#allocation20_spill] sm:$0xff] }
  0xd5   : >> { %v3107_v4 = vadd.f32 %v1017_v19, %v707_v14  ;;  %v1045_v22 = vmax.f32 %v3111_v17, 0.0  ;;  %v1046_v33 = vmax.f32 %v3113_v35, 0.0  ;;  %v3131_v37 = vadd.f32 %v3055_v11, %v822_v34  ;;  %v2485_v56 = vld [vmem:[%s3620_s5 + $0x8] sm:$0xff] }
  0xd6   : >> { %v3109_v16 = vadd.f32 %v1018_v1, %v746_v15  ;;  %v780_v1 = vadd.f32 %v3049_v8, %v549_v43  ;;  %v1051_v10 = vmax.f32 %v3128_v23, 0.0 }
  0xd7   : >> { %v1053_v30 = vmax.f32 %v3107_v4, 0.0  ;;  %v1057_v43 = vpack.c.bf16 %v1045_v22, %v1041_v39  ;;  %v1058_v53 = vpack.c.bf16 %v1046_v33, %v1042_v2 }
  0xd8   : >> { %v1054_v19 = vmax.f32 %v3109_v16, 0.0  ;;  %v3148_v50 = vadd.f32 %v1011_v24, %v780_v1  ;;  %1873 = vperm.xlu0 %2543, %v2446_v51  }
  0xd9   : >> { %v784_v3 = vpop.f32.mrf.mxu2  ;;  %v1061_v20 = vpack.c.bf16 %v1053_v30, %v1049_v26 }
  0xda   : >> { %v823_v36 = vpop.f32.mrf.mxu3  ;;  %v1062_v21 = vpack.c.bf16 %v1054_v19, %v1050_v31  ;;  %v785_v8 = vadd.f32 %v784_v3, %v2949_v61  ;;  %v1047_v49 = vmax.f32 %v3148_v50, 0.0 }
  0xdb   : >> { %v824_v44 = vadd.f32 %v823_v36, %v2949_v61  ;;  %1111 = vmatpush.bf16.msrb.mxu0 %v1061_v20  ;;  %v3150_v61 = vadd.f32 %v1012_v25, %v819_v38  ;;  %v3183_v6 = vpop.f32.mrf.mxu0 }
  0xdc   : >> { %1130 = vmatpush.bf16.msrb.mxu1 %v1062_v21  ;;  %v3143_v12 = vadd.f32 %v3068_v27, %v785_v8  ;;  %v1052_v27 = vmax.f32 %v3131_v37, 0.0  ;;  %v1059_v28 = vpack.c.bf16 %v1047_v49, %v1043_v47  ;;  %v3185_v7 = vpop.f32.mrf.mxu1  ;;  %v1082_v49 = vpop.permute.xlu2 %1081 }
  0xdd   : >> { %v3146_v11 = vadd.f32 %v3070_v60, %v824_v44  ;;  %v1048_v32 = vmax.f32 %v3150_v61, 0.0 }
  0xde   : >> { %v1055_v62 = vmax.f32 %v3143_v12, 0.0 }
  0xdf   : >> { %v1056_v60 = vmax.f32 %v3146_v11, 0.0  ;;  %1112 = vmatpush.bf16.msrb.mxu0 %v1057_v43  ;;  %v1060_v52 = vpack.c.bf16 %v1048_v32, %v1044_v48 }
  0xe0   : >> { %1131 = vmatpush.bf16.msrb.mxu1 %v1058_v53  ;;  %v1063_v54 = vpack.c.bf16 %v1055_v62, %v1051_v10  ;;  %2012 = vperm.xlu0 %2543, %v3695_v58  }
  0xe1   : >> { %v1064_v0 = vpack.c.bf16 %v1056_v60, %v1052_v27 }
  0xe2   : >> { %1149 = vmatpush.bf16.msrb.mxu2 %v1063_v54  ;;  %2344 = vmatmul.msk.bf16.vlgmr.msrb.gmra.mxu0 %vm671_vm0, %v2484_v46  ;;  %v3191_v59 = vpop.f32.mrf.mxu2 }
  0xe3   : >> { %1168 = vmatpush.bf16.msrb.mxu3 %v1064_v0  ;;  %2346 = vmatmul.msk.bf16.vlgmr.msrb.gmra.mxu1 %vm671_vm0, %v2484_v46  ;;  %v3187_v14 = vpop.f32.mrf.mxu0  ;;  %3697 = vst [vmem:[#allocation36_spill] sm:$0xff] %v3191_v59  ;;  %v3193_v13 = vpop.f32.mrf.mxu3 }
  0xe4   : >> { %v3189_v15 = vpop.f32.mrf.mxu1  ;;  %3698 = vst [vmem:[#allocation37_spill] sm:$0xff] %v3193_v13 }
  0xe6   : >> { %1150 = vmatpush.bf16.msrb.mxu2 %v1059_v28  ;;  %v1077_v28 = vpop.permute.xlu2 %1076 }
  0xe7   : >> { %1169 = vmatpush.bf16.msrb.mxu3 %v1060_v52  ;;  %v1087_v52 = vpop.permute.xlu0 %1086 }
  0xe8   : >> { %2079 = vperm.xlu0 %2543, %v3696_v57  }
  0xe9   : >> { %2348 = vmatmul.msk.bf16.vlgmr.msrb.gmra.mxu2 %vm671_vm0, %v2484_v46 }
  0xea   : >> { %2350 = vmatmul.msk.bf16.vlgmr.msrb.gmra.mxu3 %vm671_vm0, %v2484_v46  ;;  %v3199_v24 = vpop.f32.mrf.mxu2 }
  0xeb   : >> { %v3195_v45 = vpop.f32.mrf.mxu0  ;;  %v3201_v25 = vpop.f32.mrf.mxu3 }
  0xec   : >> { %v3197_v34 = vpop.f32.mrf.mxu1 }
  0xf2   : >> { %2345 = vmatmul.msk.bf16.gmra.mxu0 %vm671_vm0, %v2485_v56  ;;  %v3207_v31 = vpop.f32.mrf.mxu2 }
  0xf3   : >> { %2347 = vmatmul.msk.bf16.gmra.mxu1 %vm671_vm0, %v2485_v56  ;;  %v3203_v26 = vpop.f32.mrf.mxu0  ;;  %v3209_v19 = vpop.f32.mrf.mxu3 }
  0xf4   : >> { %v3205_v30 = vpop.f32.mrf.mxu1 }
  0xf9   : >> { %2349 = vmatmul.msk.bf16.gmra.mxu2 %vm671_vm0, %v2485_v56 }
  0xfa   : >> { %2351 = vmatmul.msk.bf16.gmra.mxu3 %vm671_vm0, %v2485_v56  ;;  %v3215_v39 = vpop.f32.mrf.mxu2 }
  0xfb   : >> { %v3211_v1 = vpop.f32.mrf.mxu0  ;;  %v3217_v2 = vpop.f32.mrf.mxu3 }
  0xfc   : >> { %3699 = vst [vmem:[#allocation38_spill] sm:$0xff] %v3211_v1  ;;  %v3213_v38 = vpop.f32.mrf.mxu1 }
  0xfd   : >> { %3700 = vst [vmem:[#allocation39_spill] sm:$0xff] %v3213_v38 }
 0x102   : >> { %v3223_v20 = vpop.f32.mrf.mxu2 }
 0x103   : >> { %v3219_v3 = vpop.f32.mrf.mxu0  ;;  %3703 = vst [vmem:[#allocation42_spill] sm:$0xff] %v3223_v20  ;;  %v3225_v21 = vpop.f32.mrf.mxu3 }
 0x104   : >> { %3701 = vst [vmem:[#allocation40_spill] sm:$0xff] %v3219_v3  ;;  %v3221_v36 = vpop.f32.mrf.mxu1  ;;  %v1072_v20 = vpop.permute.xlu1 %1071 }
 0x105   : >> { %3702 = vst [vmem:[#allocation41_spill] sm:$0xff] %v3221_v36 }
 0x106   : >> { %3704 = vst [vmem:[#allocation43_spill] sm:$0xff] %v3225_v21 }
 0x10a   : >> { %v3231_v8 = vpop.f32.mrf.mxu2 }
 0x10b   : >> { %v3227_v22 = vpop.f32.mrf.mxu0  ;;  %3707 = vst [vmem:[#allocation46_spill] sm:$0xff] %v3231_v8  ;;  %v3233_v44 = vpop.f32.mrf.mxu3 }
 0x10c   : >> { %3705 = vst [vmem:[#allocation44_spill] sm:$0xff] %v3227_v22  ;;  %v3229_v33 = vpop.f32.mrf.mxu1 }
 0x10d   : >> { %3706 = vst [vmem:[#allocation45_spill] sm:$0xff] %v3229_v33 }
 0x10e   : >> { %3708 = vst [vmem:[#allocation47_spill] sm:$0xff] %v3233_v44 }
 0x112   : >> { %v3239_v42 = vpop.f32.mrf.mxu2 }
 0x113   : >> { %v3235_v40 = vpop.f32.mrf.mxu0  ;;  %3711 = vst [vmem:[#allocation50_spill] sm:$0xff] %v3239_v42  ;;  %v3241_v43 = vpop.f32.mrf.mxu3 }
 0x114   : >> { %3709 = vst [vmem:[#allocation48_spill] sm:$0xff] %v3235_v40  ;;  %v3237_v41 = vpop.f32.mrf.mxu1 }
 0x115   : >> { %3710 = vst [vmem:[#allocation49_spill] sm:$0xff] %v3237_v41 }
 0x116   : >> { %3712 = vst [vmem:[#allocation51_spill] sm:$0xff] %v3241_v43 }
 0x11a   : >> { %v3243_v62 = vpop.f32.mrf.mxu2 }
 0x11b   : >> { %3713 = vst [vmem:[#allocation52_spill] sm:$0xff] %v3243_v62  ;;  %v3245_v27 = vpop.f32.mrf.mxu3 }
 0x11c   : >> { %3714 = vst [vmem:[#allocation53_spill] sm:$0xff] %v3245_v27 }
 0x15f   : >> { %v1114_v53 = vpop.f32.mrf.mxu0 }
 0x160   : >> { %v1133_v10 = vpop.f32.mrf.mxu1  ;;  %v1115_v44 = vadd.f32 %v1114_v53, %v1072_v20 }
 0x161   : >> { %v1134_v8 = vadd.f32 %v1133_v10, %v1072_v20 }
 0x163   : >> { %v1186_v59 = vmax.f32 %v1134_v8, 0.0 }
 0x167   : >> { %v1116_v60 = vpop.f32.mrf.mxu0 }
 0x168   : >> { %v1135_v46 = vpop.f32.mrf.mxu1  ;;  %v1117_v43 = vadd.f32 %v1116_v60, %v1077_v28 }
 0x169   : >> { %v1136_v42 = vadd.f32 %v1135_v46, %v1077_v28 }
 0x16a   : >> { %v1189_v36 = vmax.f32 %v1117_v43, 0.0 }
 0x16b   : >> { %v1190_v3 = vmax.f32 %v1136_v42, 0.0 }
 0x16c   : >> { %v1152_v54 = vpop.f32.mrf.mxu2 }
 0x16d   : >> { %v1171_v0 = vpop.f32.mrf.mxu3  ;;  %v1202_v46 = vpack.c.bf16 %v1190_v3, %v1186_v59 }
 0x16e   : >> { %v1172_v8 = vadd.f32 %v1171_v0, %v1072_v20 }
 0x16f   : >> { %v1119_v32 = vpop.f32.mrf.mxu0 }
 0x170   : >> { %v1138_v47 = vpop.f32.mrf.mxu1  ;;  %v1120_v58 = vadd.f32 %v1119_v32, %v1082_v49 }
 0x171   : >> { %v1139_v56 = vadd.f32 %v1138_v47, %v1082_v49  ;;  %v1185_v47 = vmax.f32 %v1115_v44, 0.0  ;;  %v1153_v44 = vadd.f32 %v1152_v54, %v1072_v20  ;;  %v2487_v20 = vld [vmem:[%s3622_s7 + $0x8] sm:$0xff] }
 0x172   : >> { %v1193_v38 = vmax.f32 %v1120_v58, 0.0  ;;  %v1188_v58 = vmax.f32 %v1172_v8, 0.0 }
 0x173   : >> { %v1194_v1 = vmax.f32 %v1139_v56, 0.0  ;;  %v1201_v60 = vpack.c.bf16 %v1189_v36, %v1185_v47 }
 0x174   : >> { %v1154_v48 = vpop.f32.mrf.mxu2 }
 0x175   : >> { %v1173_v51 = vpop.f32.mrf.mxu3  ;;  %v1155_v43 = vadd.f32 %v1154_v48, %v1077_v28 }
 0x176   : >> { %v1174_v42 = vadd.f32 %v1173_v51, %v1077_v28  ;;  %v3261_v28 = vpop.permute.xlu2 %1230 }
 0x177   : >> { %v1121_v57 = vpop.f32.mrf.mxu0 }
 0x178   : >> { %v1140_v21 = vpop.f32.mrf.mxu1  ;;  %v1122_v62 = vadd.f32 %v1121_v57, %v1087_v52 }
 0x179   : >> { %v1141_v27 = vadd.f32 %v1140_v21, %v1087_v52  ;;  %v2486_v21 = vld [vmem:[%s3622_s7] sm:$0xff] }
 0x17a   : >> { %v1197_v41 = vmax.f32 %v1122_v62, 0.0 }
 0x17b   : >> { %v1198_v40 = vmax.f32 %v1141_v27, 0.0 }
 0x17c   : >> { %v1157_v33 = vpop.f32.mrf.mxu2  ;;  %v1205_v13 = vpack.c.bf16 %v1197_v41, %v1193_v38 }
 0x17d   : >> { %v1176_v22 = vpop.f32.mrf.mxu3  ;;  %v1206_v32 = vpack.c.bf16 %v1198_v40, %v1194_v1  ;;  %v1158_v53 = vadd.f32 %v1157_v33, %v1082_v49  ;;  %v1191_v33 = vmax.f32 %v1155_v43, 0.0 }
 0x17e   : >> { %1255 = vmatpush.bf16.msra.mxu0 %v1205_v13  ;;  %v1177_v10 = vadd.f32 %v1176_v22, %v1082_v49  ;;  %v1192_v22 = vmax.f32 %v1174_v42, 0.0  ;;  %v1187_v49 = vmax.f32 %v1153_v44, 0.0  ;;  %v3267_v47 = vpop.permute.xlu2 %1215 }
 0x17f   : >> { %1274 = vmatpush.bf16.msra.mxu1 %v1206_v32  ;;  %v1195_v59 = vmax.f32 %v1158_v53, 0.0  ;;  %v3265_v32 = vpop.permute.xlu0 %573 }
 0x180   : >> { %v1196_v13 = vmax.f32 %v1177_v10, 0.0  ;;  %v1203_v48 = vpack.c.bf16 %v1191_v33, %v1187_v49  ;;  %v1204_v51 = vpack.c.bf16 %v1192_v22, %v1188_v58  ;;  %v715_v33 = vadd.f32 %v3195_v45, %v3265_v32 }
 0x181   : >> { %v754_v22 = vadd.f32 %v3197_v34, %v3265_v32 }
 0x182   : >> { %1256 = vmatpush.bf16.msra.mxu0 %v1201_v60 }
 0x183   : >> { %1275 = vmatpush.bf16.msra.mxu1 %v1202_v46 }
 0x184   : >> { %v1159_v62 = vpop.f32.mrf.mxu2 }
 0x185   : >> { %v1178_v27 = vpop.f32.mrf.mxu3  ;;  %v1160_v38 = vadd.f32 %v1159_v62, %v1087_v52  ;;  %2360 = vmatmul.msk.bf16.vlgmr.msra.gmra.mxu0 %vm671_vm0, %v2486_v21 }
 0x186   : >> { %v1179_v1 = vadd.f32 %v1178_v27, %v1087_v52  ;;  %2362 = vmatmul.msk.bf16.vlgmr.msra.gmra.mxu1 %vm671_vm0, %v2486_v21  ;;  %v3263_v52 = vpop.permute.xlu1 %1225  ;;  %v569_v8 = vpop.permute.xlu2 %568 }
 0x187   : >> { %v1199_v3 = vmax.f32 %v1160_v38, 0.0  ;;  %v1221_v43 = vpop.permute.xlu0 %1220 }
 0x188   : >> { %v1200_v36 = vmax.f32 %v1179_v1, 0.0 }
 0x189   : >> { %v1207_v40 = vpack.c.bf16 %v1199_v3, %v1195_v59  ;;  %v712_v3 = vadd.f32 %v3187_v14, %v569_v8 }
 0x18a   : >> { %v1208_v41 = vpack.c.bf16 %v1200_v36, %v1196_v13  ;;  %v751_v36 = vadd.f32 %v3189_v15, %v569_v8 }
 0x18b   : >> { %1293 = vmatpush.bf16.msra.mxu2 %v1207_v40 }
 0x18c   : >> { %1312 = vmatpush.bf16.msra.mxu3 %v1208_v41 }
 0x18e   : >> { %v3269_v60 = vpop.permute.xlu1 %578 }
 0x18f   : >> { %1294 = vmatpush.bf16.msra.mxu2 %v1203_v48  ;;  %v717_v15 = vadd.f32 %v3203_v26, %v3269_v60  ;;  %v756_v45 = vadd.f32 %v3205_v30, %v3269_v60 }
 0x190   : >> { %1313 = vmatpush.bf16.msra.mxu3 %v1204_v51 }
 0x192   : >> { %2364 = vmatmul.msk.bf16.vlgmr.msra.gmra.mxu2 %vm671_vm0, %v2486_v21 }
 0x193   : >> { %2366 = vmatmul.msk.bf16.vlgmr.msra.gmra.mxu3 %vm671_vm0, %v2486_v21 }
 0x195   : >> { %2361 = vmatmul.msk.bf16.gmra.mxu0 %vm671_vm0, %v2487_v20 }
 0x196   : >> { %2363 = vmatmul.msk.bf16.gmra.mxu1 %vm671_vm0, %v2487_v20  ;;  %v3287_v49 = vpop.permute.xlu1 %563 }
 0x197   : >> { %v710_v26 = vadd.f32 %v3183_v6, %v3287_v49  ;;  %v749_v30 = vadd.f32 %v3185_v7, %v3287_v49 }
 0x1a2   : >> { %2365 = vmatmul.msk.bf16.gmra.mxu2 %vm671_vm0, %v2487_v20 }
 0x1a3   : >> { %2367 = vmatmul.msk.bf16.gmra.mxu3 %vm671_vm0, %v2487_v20 }
 0x202   : >> { %v1258_v54 = vpop.f32.mrf.mxu0 }
 0x203   : >> { %v1277_v0 = vpop.f32.mrf.mxu1  ;;  %v1259_v1 = vadd.f32 %v1258_v54, %v3267_v47 }
 0x204   : >> { %v1278_v44 = vadd.f32 %v1277_v0, %v3267_v47 }
 0x205   : >> { %v1325_v34 = vadd.f32 %v1259_v1, %v3103_v55 }
 0x206   : >> { %v1326_v48 = vadd.f32 %v1278_v44, %v3105_v29 }
 0x20a   : >> { %v1260_v56 = vpop.f32.mrf.mxu0 }
 0x20b   : >> { %v1279_v57 = vpop.f32.mrf.mxu1  ;;  %v1261_v42 = vadd.f32 %v1260_v56, %v1221_v43 }
 0x20c   : >> { %v1280_v38 = vadd.f32 %v1279_v57, %v1221_v43 }
 0x20d   : >> { %v1329_v58 = vadd.f32 %v1261_v42, %v3111_v17 }
 0x20f   : >> { %v3309_v56 = vadd.f32 %v1329_v58, %v712_v3 }
 0x211   : >> { %v1366_v42 = vmax.f32 %v3309_v56, 0.0 }
 0x212   : >> { %v1263_v46 = vpop.f32.mrf.mxu0 }
 0x213   : >> { %v1282_v21 = vpop.f32.mrf.mxu1  ;;  %v1264_v62 = vadd.f32 %v1263_v46, %v3263_v52  ;;  %v3317_v46 = vadd.f32 %v1325_v34, %v710_v26  ;;  %v793_v34 = vadd.f32 %v3207_v31, %v3265_v32  ;;  %v795_v31 = vadd.f32 %v3215_v39, %v3269_v60  ;;  %v3716_v39 = vld [vmem:[#allocation37_spill] sm:$0xff] }
 0x214   : >> { %v1283_v27 = vadd.f32 %v1282_v21, %v3263_v52  ;;  %v3319_v21 = vadd.f32 %v1326_v48, %v749_v30 }
 0x215   : >> { %v3271_v53 = vpop.f32.mrf.mxu2  ;;  %v1333_v59 = vadd.f32 %v1264_v62, %v3097_v18  ;;  %v1330_v18 = vadd.f32 %v1280_v38, %v3113_v35 }
 0x216   : >> { %v3273_v10 = vpop.f32.mrf.mxu3  ;;  %v1334_v13 = vadd.f32 %v1283_v27, %v3099_v5 }
 0x217   : >> { %v3299_v54 = vadd.f32 %v1333_v59, %v715_v33  ;;  %v3311_v55 = vadd.f32 %v1330_v18, %v751_v36  ;;  %v1362_v59 = vmax.f32 %v3317_v46, 0.0  ;;  %v1297_v18 = vadd.f32 %v3271_v53, %v3267_v47 }
 0x218   : >> { %v3301_v17 = vadd.f32 %v1334_v13, %v754_v22  ;;  %v1363_v13 = vmax.f32 %v3319_v21, 0.0 }
 0x219   : >> { %v1367_v38 = vmax.f32 %v3311_v55, 0.0  ;;  %v1378_v33 = vpack.c.bf16 %v1366_v42, %v1362_v59 }
 0x21a   : >> { %v1265_v40 = vpop.f32.mrf.mxu0 }
 0x21b   : >> { %v1284_v41 = vpop.f32.mrf.mxu1  ;;  %v1266_v5 = vadd.f32 %v1265_v40, %v3261_v28  ;;  %v1379_v22 = vpack.c.bf16 %v1367_v38, %v1363_v13  ;;  %v2488_v40 = vld [vmem:[%s3620_s5 + $0x10] sm:$0xff] }
 0x21c   : >> { %v1285_v14 = vadd.f32 %v1284_v41, %v3261_v28 }
 0x21d   : >> { %v1298_v51 = vpop.f32.mrf.mxu2  ;;  %v1337_v35 = vadd.f32 %v1266_v5, %v3107_v4  ;;  %v1370_v4 = vmax.f32 %v3299_v54, 0.0  ;;  %v1316_v5 = vadd.f32 %v3273_v10, %v3267_v47 }
 0x21e   : >> { %v1317_v20 = vpop.f32.mrf.mxu3  ;;  %v1338_v0 = vadd.f32 %v1285_v14, %v3109_v16  ;;  %v1371_v16 = vmax.f32 %v3301_v17, 0.0  ;;  %v1299_v41 = vadd.f32 %v1298_v51, %v1221_v43  ;;  %v790_v14 = vadd.f32 %v3199_v24, %v569_v8 }
 0x21f   : >> { %v3313_v29 = vadd.f32 %v1337_v35, %v717_v15  ;;  %v1318_v58 = vadd.f32 %v1317_v20, %v1221_v43  ;;  %v832_v43 = vadd.f32 %v3209_v19, %v3265_v32  ;;  %v834_v19 = vadd.f32 %v3217_v2, %v3269_v60 }
 0x220   : >> { %v3315_v57 = vadd.f32 %v1338_v0, %v756_v45  ;;  %v829_v45 = vadd.f32 %v3201_v25, %v569_v8  ;;  %v1331_v24 = vadd.f32 %v1299_v41, %v3148_v50  ;;  %v1327_v32 = vadd.f32 %v1297_v18, %v3152_v63  ;;  %v1409_v41 = vpop.permute.xlu1 %1408 }
 0x221   : >> { %v1374_v6 = vmax.f32 %v3313_v29, 0.0  ;;  %v1328_v47 = vadd.f32 %v1316_v5, %v3154_v9  ;;  %v827_v20 = vadd.f32 %v3716_v39, %v3287_v49 }
 0x222   : >> { %v1375_v7 = vmax.f32 %v3315_v57, 0.0  ;;  %v3368_v35 = vadd.f32 %v1331_v24, %v790_v14 }
 0x223   : >> { %v1382_v62 = vpack.c.bf16 %v1374_v6, %v1370_v4  ;;  %v3378_v0 = vadd.f32 %v1328_v47, %v827_v20 }
 0x224   : >> { %v1383_v27 = vpack.c.bf16 %v1375_v7, %v1371_v16  ;;  %v1368_v16 = vmax.f32 %v3368_v35, 0.0 }
 0x225   : >> { %v1301_v1 = vpop.f32.mrf.mxu2  ;;  %1433 = vmatpush.bf16.msrb.mxu0 %v1382_v62  ;;  %v1365_v62 = vmax.f32 %v3378_v0, 0.0 }
 0x226   : >> { %v1320_v44 = vpop.f32.mrf.mxu3  ;;  %1452 = vmatpush.bf16.msrb.mxu1 %v1383_v27  ;;  %v1302_v3 = vadd.f32 %v1301_v1, %v3263_v52  ;;  %v2489_v27 = vld [vmem:[%s3620_s5 + $0x18] sm:$0xff] }
 0x227   : >> { %v1321_v36 = vadd.f32 %v1320_v44, %v3263_v52 }
 0x228   : >> { %v1335_v52 = vadd.f32 %v1302_v3, %v3128_v23  ;;  %v1332_v23 = vadd.f32 %v1318_v58, %v3150_v61  ;;  %v1404_v3 = vpop.permute.xlu0 %1403 }
 0x229   : >> { %1434 = vmatpush.bf16.msrb.mxu0 %v1378_v33  ;;  %v1336_v15 = vadd.f32 %v1321_v36, %v3131_v37 }
 0x22a   : >> { %1453 = vmatpush.bf16.msrb.mxu1 %v1379_v22  ;;  %v3358_v53 = vadd.f32 %v1335_v52, %v793_v34  ;;  %v3370_v2 = vadd.f32 %v1332_v23, %v829_v45  ;;  %v1394_v22 = vpop.permute.xlu2 %1393 }
 0x22b   : >> { %v3360_v10 = vadd.f32 %v1336_v15, %v832_v43 }
 0x22c   : >> { %2384 = vmatmul.msk.bf16.vlgmr.msrb.gmra.mxu0 %vm671_vm0, %v2488_v40  ;;  %v1369_v6 = vmax.f32 %v3370_v2, 0.0 }
 0x22d   : >> { %v1303_v48 = vpop.f32.mrf.mxu2  ;;  %2386 = vmatmul.msk.bf16.vlgmr.msrb.gmra.mxu1 %vm671_vm0, %v2488_v40 }
 0x22e   : >> { %v1322_v51 = vpop.f32.mrf.mxu3  ;;  %v1304_v37 = vadd.f32 %v1303_v48, %v3261_v28  ;;  %v1381_v38 = vpack.c.bf16 %v1369_v6, %v1365_v62 }
 0x22f   : >> { %v1323_v25 = vadd.f32 %v1322_v51, %v3261_v28  ;;  %v3715_v28 = vld [vmem:[#allocation36_spill] sm:$0xff] }
 0x230   : >> { %v1339_v50 = vadd.f32 %v1304_v37, %v3143_v12  ;;  %v788_v8 = vadd.f32 %v3715_v28, %v3287_v49  ;;  %v1372_v12 = vmax.f32 %v3358_v53, 0.0  ;;  %v1399_v58 = vpop.permute.xlu0 %1398 }
 0x231   : >> { %v1340_v61 = vadd.f32 %v1323_v25, %v3146_v11  ;;  %v1373_v11 = vmax.f32 %v3360_v10, 0.0 }
 0x232   : >> { %v3372_v63 = vadd.f32 %v1339_v50, %v795_v31  ;;  %v3376_v60 = vadd.f32 %v1327_v32, %v788_v8 }
 0x233   : >> { %v3374_v9 = vadd.f32 %v1340_v61, %v834_v19 }
 0x234   : >> { %v1376_v26 = vmax.f32 %v3372_v63, 0.0  ;;  %v1364_v7 = vmax.f32 %v3376_v60, 0.0 }
 0x235   : >> { %v1377_v49 = vmax.f32 %v3374_v9, 0.0 }
 0x236   : >> { %v1384_v30 = vpack.c.bf16 %v1376_v26, %v1372_v12  ;;  %v1380_v42 = vpack.c.bf16 %v1368_v16, %v1364_v7 }
 0x237   : >> { %v1385_v4 = vpack.c.bf16 %v1377_v49, %v1373_v11  ;;  %v2490_v11 = vld [vmem:[%s3622_s7 + $0x10] sm:$0xff] }
 0x238   : >> { %1471 = vmatpush.bf16.msrb.mxu2 %v1384_v30 }
 0x239   : >> { %1490 = vmatpush.bf16.msrb.mxu3 %v1385_v4 }
 0x23c   : >> { %1472 = vmatpush.bf16.msrb.mxu2 %v1380_v42  ;;  %2385 = vmatmul.msk.bf16.gmra.mxu0 %vm671_vm0, %v2489_v27 }
 0x23d   : >> { %1491 = vmatpush.bf16.msrb.mxu3 %v1381_v38  ;;  %2387 = vmatmul.msk.bf16.gmra.mxu1 %vm671_vm0, %v2489_v27  ;;  %v2491_v38 = vld [vmem:[%s3622_s7 + $0x18] sm:$0xff] }
 0x23f   : >> { %2388 = vmatmul.msk.bf16.vlgmr.msrb.gmra.mxu2 %vm671_vm0, %v2488_v40 }
 0x240   : >> { %2390 = vmatmul.msk.bf16.vlgmr.msrb.gmra.mxu3 %vm671_vm0, %v2488_v40 }
 0x24f   : >> { %2389 = vmatmul.msk.bf16.gmra.mxu2 %vm671_vm0, %v2489_v27 }
 0x250   : >> { %2391 = vmatmul.msk.bf16.gmra.mxu3 %vm671_vm0, %v2489_v27 }
 0x2a9   : >> { %v1436_v1 = vpop.f32.mrf.mxu0 }
 0x2aa   : >> { %v1455_v44 = vpop.f32.mrf.mxu1  ;;  %v1437_v51 = vadd.f32 %v1436_v1, %v1394_v22 }
 0x2ab   : >> { %v1456_v24 = vadd.f32 %v1455_v44, %v1394_v22 }
 0x2ac   : >> { %v1508_v61 = vmax.f32 %v1437_v51, 0.0  ;;  %v3415_v51 = vpop.permute.xlu0 %593 }
 0x2ad   : >> { %v1509_v28 = vmax.f32 %v1456_v24, 0.0 }
 0x2b1   : >> { %v1438_v59 = vpop.f32.mrf.mxu0 }
 0x2b2   : >> { %v1457_v13 = vpop.f32.mrf.mxu1  ;;  %v1439_v15 = vadd.f32 %v1438_v59, %v1399_v58 }
 0x2b3   : >> { %v1458_v40 = vadd.f32 %v1457_v13, %v1399_v58 }
 0x2b4   : >> { %v1512_v19 = vmax.f32 %v1439_v15, 0.0 }
 0x2b5   : >> { %v1513_v32 = vmax.f32 %v1458_v40, 0.0 }
 0x2b6   : >> { %v1524_v8 = vpack.c.bf16 %v1512_v19, %v1508_v61 }
 0x2b7   : >> { %v1525_v39 = vpack.c.bf16 %v1513_v32, %v1509_v28  ;;  %v3423_v32 = vpop.permute.xlu0 %1544 }
 0x2b9   : >> { %v1441_v36 = vpop.f32.mrf.mxu0 }
 0x2ba   : >> { %v1460_v33 = vpop.f32.mrf.mxu1  ;;  %v1442_v18 = vadd.f32 %v1441_v36, %v1404_v3 }
 0x2bb   : >> { %v1461_v5 = vadd.f32 %v1460_v33, %v1404_v3 }
 0x2bc   : >> { %v1516_v23 = vmax.f32 %v1442_v18, 0.0 }
 0x2bd   : >> { %v1517_v37 = vmax.f32 %v1461_v5, 0.0 }
 0x2c1   : >> { %v1443_v14 = vpop.f32.mrf.mxu0 }
 0x2c2   : >> { %v1462_v52 = vpop.f32.mrf.mxu1  ;;  %v1444_v45 = vadd.f32 %v1443_v14, %v1409_v41  ;;  %v1474_v43 = vpop.f32.mrf.mxu2 }
 0x2c3   : >> { %v1463_v34 = vadd.f32 %v1462_v52, %v1409_v41  ;;  %v1493_v48 = vpop.f32.mrf.mxu3  ;;  %v1475_v1 = vadd.f32 %v1474_v43, %v1394_v22 }
 0x2c4   : >> { %v1520_v25 = vmax.f32 %v1444_v45, 0.0  ;;  %v1494_v44 = vadd.f32 %v1493_v48, %v1394_v22  ;;  %v3411_v45 = vpop.permute.xlu2 %1554 }
 0x2c5   : >> { %v1521_v31 = vmax.f32 %v1463_v34, 0.0  ;;  %v3413_v34 = vpop.permute.xlu1 %1549 }
 0x2c6   : >> { %v1528_v47 = vpack.c.bf16 %v1520_v25, %v1516_v23 }
 0x2c7   : >> { %v1529_v50 = vpack.c.bf16 %v1521_v31, %v1517_v37 }
 0x2c8   : >> { %1579 = vmatpush.bf16.msra.mxu0 %v1528_v47 }
 0x2c9   : >> { %1598 = vmatpush.bf16.msra.mxu1 %v1529_v50 }
 0x2ca   : >> { %v1476_v20 = vpop.f32.mrf.mxu2 }
 0x2cb   : >> { %v1495_v12 = vpop.f32.mrf.mxu3  ;;  %v1477_v7 = vadd.f32 %v1476_v20, %v1399_v58 }
 0x2cc   : >> { %1580 = vmatpush.bf16.msra.mxu0 %v1524_v8  ;;  %v1496_v62 = vadd.f32 %v1495_v12, %v1399_v58  ;;  %v1510_v58 = vmax.f32 %v1475_v1, 0.0  ;;  %v3417_v24 = vpop.permute.xlu2 %1539  ;;  %v3717_v12 = vld [vmem:[#allocation40_spill] sm:$0xff] }
 0x2cd   : >> { %1599 = vmatpush.bf16.msra.mxu1 %v1525_v39  ;;  %v1514_v18 = vmax.f32 %v1477_v7, 0.0  ;;  %v3419_v23 = vpop.permute.xlu1 %598  ;;  %v3721_v1 = vld [vmem:[#allocation48_spill] sm:$0xff] }
 0x2ce   : >> { %v1515_v5 = vmax.f32 %v1496_v62, 0.0 }
 0x2cf   : >> { %2408 = vmatmul.msk.bf16.vlgmr.msra.gmra.mxu0 %vm671_vm0, %v2490_v11  ;;  %v1526_v52 = vpack.c.bf16 %v1514_v18, %v1510_v58  ;;  %v3724_v58 = vld [vmem:[#allocation39_spill] sm:$0xff] }
 0x2d0   : >> { %2410 = vmatmul.msk.bf16.vlgmr.msra.gmra.mxu1 %vm671_vm0, %v2490_v11 }
 0x2d2   : >> { %v1479_v26 = vpop.f32.mrf.mxu2 }
 0x2d3   : >> { %v1498_v49 = vpop.f32.mrf.mxu3  ;;  %v1480_v30 = vadd.f32 %v1479_v26, %v1404_v3  ;;  %v3718_v26 = vld [vmem:[#allocation41_spill] sm:$0xff] }
 0x2d4   : >> { %v1499_v4 = vadd.f32 %v1498_v49, %v1404_v3  ;;  %v3429_v8 = vpop.permute.xlu2 %588 }
 0x2d5   : >> { %v1518_v59 = vmax.f32 %v1480_v30, 0.0  ;;  %v761_v49 = vadd.f32 %v3718_v26, %v3429_v8  ;;  %v3719_v30 = vld [vmem:[#allocation44_spill] sm:$0xff] }
 0x2d6   : >> { %v1519_v13 = vmax.f32 %v1499_v4, 0.0  ;;  %v725_v4 = vadd.f32 %v3719_v30, %v3415_v51 }
 0x2da   : >> { %v1481_v16 = vpop.f32.mrf.mxu2 }
 0x2db   : >> { %v1500_v6 = vpop.f32.mrf.mxu3  ;;  %v1482_v27 = vadd.f32 %v1481_v16, %v1409_v41  ;;  %v3720_v16 = vld [vmem:[#allocation45_spill] sm:$0xff] }
 0x2dc   : >> { %v1501_v42 = vadd.f32 %v1500_v6, %v1409_v41  ;;  %v1511_v41 = vmax.f32 %v1494_v44, 0.0  ;;  %v764_v6 = vadd.f32 %v3720_v16, %v3415_v51  ;;  %v727_v44 = vadd.f32 %v3721_v1, %v3419_v23 }
 0x2dd   : >> { %v1522_v36 = vmax.f32 %v1482_v27, 0.0  ;;  %v3441_v27 = vpop.permute.xlu1 %583 }
 0x2de   : >> { %v1523_v33 = vmax.f32 %v1501_v42, 0.0  ;;  %v1527_v15 = vpack.c.bf16 %v1515_v5, %v1511_v41  ;;  %v759_v41 = vadd.f32 %v3724_v58, %v3441_v27 }
 0x2df   : >> { %v1530_v14 = vpack.c.bf16 %v1522_v36, %v1518_v59  ;;  %2409 = vmatmul.msk.bf16.gmra.mxu0 %vm671_vm0, %v2491_v38  ;;  %v3722_v59 = vld [vmem:[#allocation49_spill] sm:$0xff] }
 0x2e0   : >> { %v1531_v3 = vpack.c.bf16 %v1523_v33, %v1519_v13  ;;  %2411 = vmatmul.msk.bf16.gmra.mxu1 %vm671_vm0, %v2491_v38  ;;  %v766_v13 = vadd.f32 %v3722_v59, %v3419_v23 }
 0x2e1   : >> { %1617 = vmatpush.bf16.msra.mxu2 %v1530_v14  ;;  %v3723_v14 = vld [vmem:[#allocation38_spill] sm:$0xff] }
 0x2e2   : >> { %1636 = vmatpush.bf16.msra.mxu3 %v1531_v3  ;;  %v720_v3 = vadd.f32 %v3723_v14, %v3441_v27 }
 0x2e5   : >> { %1618 = vmatpush.bf16.msra.mxu2 %v1526_v52 }
 0x2e6   : >> { %1637 = vmatpush.bf16.msra.mxu3 %v1527_v15 }
 0x2e8   : >> { %2412 = vmatmul.msk.bf16.vlgmr.msra.gmra.mxu2 %vm671_vm0, %v2490_v11 }
 0x2e9   : >> { %2414 = vmatmul.msk.bf16.vlgmr.msra.gmra.mxu3 %vm671_vm0, %v2490_v11  ;;  %v722_v11 = vadd.f32 %v3717_v12, %v3429_v8  ;;  %v3486_v12 = vld [vmem:[%s3620_s5 + $0x20] sm:$0xff] }
 0x2f8   : >> { %2413 = vmatmul.msk.bf16.gmra.mxu2 %vm671_vm0, %v2491_v38 }
 0x2f9   : >> { %2415 = vmatmul.msk.bf16.gmra.mxu3 %vm671_vm0, %v2491_v38 }
 0x34c   : >> { %v1582_v22 = vpop.f32.mrf.mxu0 }
 0x34d   : >> { %v1601_v40 = vpop.f32.mrf.mxu1  ;;  %v1583_v61 = vadd.f32 %v1582_v22, %v3417_v24 }
 0x34e   : >> { %v1602_v28 = vadd.f32 %v1601_v40, %v3417_v24 }
 0x34f   : >> { %v1649_v36 = vadd.f32 %v1583_v61, %v3317_v46 }
 0x350   : >> { %v1650_v33 = vadd.f32 %v1602_v28, %v3319_v21 }
 0x351   : >> { %v3471_v22 = vadd.f32 %v1649_v36, %v720_v3  ;;  %v3728_v36 = vld [vmem:[#allocation50_spill] sm:$0xff] }
 0x352   : >> { %v3473_v40 = vadd.f32 %v1650_v33, %v759_v41 }
 0x353   : >> { %v1686_v61 = vmax.f32 %v3471_v22, 0.0 }
 0x354   : >> { %v1584_v43 = vpop.f32.mrf.mxu0  ;;  %v1687_v28 = vmax.f32 %v3473_v40, 0.0 }
 0x355   : >> { %v1603_v48 = vpop.f32.mrf.mxu1  ;;  %v1585_v47 = vadd.f32 %v1584_v43, %v3423_v32 }
 0x356   : >> { %v1604_v50 = vadd.f32 %v1603_v48, %v3423_v32 }
 0x35c   : >> { %v1587_v37 = vpop.f32.mrf.mxu0 }
 0x35d   : >> { %v1606_v25 = vpop.f32.mrf.mxu1  ;;  %v1588_v31 = vadd.f32 %v1587_v37, %v3413_v34 }
 0x35e   : >> { %v1607_v19 = vadd.f32 %v1606_v25, %v3413_v34 }
 0x35f   : >> { %v1657_v39 = vadd.f32 %v1588_v31, %v3299_v54  ;;  %v1653_v54 = vadd.f32 %v1585_v47, %v3309_v56 }
 0x360   : >> { %v1658_v20 = vadd.f32 %v1607_v19, %v3301_v17  ;;  %v1654_v17 = vadd.f32 %v1604_v50, %v3311_v55 }
 0x361   : >> { %v3453_v18 = vadd.f32 %v1657_v39, %v725_v4  ;;  %v3463_v52 = vadd.f32 %v1653_v54, %v722_v11 }
 0x362   : >> { %v3455_v5 = vadd.f32 %v1658_v20, %v764_v6  ;;  %v3465_v15 = vadd.f32 %v1654_v17, %v761_v49 }
 0x363   : >> { %v1690_v47 = vmax.f32 %v3463_v52, 0.0 }
 0x364   : >> { %v1589_v7 = vpop.f32.mrf.mxu0  ;;  %v1691_v50 = vmax.f32 %v3465_v15, 0.0 }
 0x365   : >> { %v1608_v62 = vpop.f32.mrf.mxu1  ;;  %v1590_v42 = vadd.f32 %v1589_v7, %v3411_v45  ;;  %v1702_v39 = vpack.c.bf16 %v1690_v47, %v1686_v61 }
 0x366   : >> { %v1609_v38 = vadd.f32 %v1608_v62, %v3411_v45  ;;  %v1703_v20 = vpack.c.bf16 %v1691_v50, %v1687_v28 }
 0x367   : >> { %v1661_v56 = vadd.f32 %v1590_v42, %v3313_v29  ;;  %v1694_v29 = vmax.f32 %v3453_v18, 0.0  ;;  %v3725_v42 = vld [vmem:[#allocation46_spill] sm:$0xff] }
 0x368   : >> { %v1662_v55 = vadd.f32 %v1609_v38, %v3315_v57  ;;  %v1695_v57 = vmax.f32 %v3455_v5, 0.0  ;;  %v800_v38 = vadd.f32 %v3725_v42, %v3429_v8  ;;  %v1733_v42 = vpop.permute.xlu1 %1732 }
 0x369   : >> { %v3467_v46 = vadd.f32 %v1661_v56, %v727_v44  ;;  %v2493_v44 = vld [vmem:[%s3620_s5 + $0x28] sm:$0xff] }
 0x36a   : >> { %v3469_v21 = vadd.f32 %v1662_v55, %v766_v13 }
 0x36b   : >> { %v1698_v43 = vmax.f32 %v3467_v46, 0.0  ;;  %v1620_v37 = vpop.f32.mrf.mxu2 }
 0x36c   : >> { %v1699_v48 = vmax.f32 %v3469_v21, 0.0  ;;  %v1639_v25 = vpop.f32.mrf.mxu3  ;;  %v1621_v62 = vadd.f32 %v1620_v37, %v3417_v24 }
 0x36d   : >> { %v1706_v31 = vpack.c.bf16 %v1698_v43, %v1694_v29  ;;  %v1640_v54 = vadd.f32 %v1639_v25, %v3417_v24  ;;  %v803_v24 = vadd.f32 %v3728_v36, %v3415_v51 }
 0x36e   : >> { %v1707_v19 = vpack.c.bf16 %v1699_v48, %v1695_v57  ;;  %v1651_v29 = vadd.f32 %v1621_v62, %v3376_v60  ;;  %v1728_v62 = vpop.permute.xlu0 %1727 }
 0x36f   : >> { %1757 = vmatpush.bf16.msrb.mxu0 %v1706_v31  ;;  %v1652_v57 = vadd.f32 %v1640_v54, %v3378_v0 }
 0x370   : >> { %1776 = vmatpush.bf16.msrb.mxu1 %v1707_v19 }
 0x373   : >> { %v1622_v11 = vpop.f32.mrf.mxu2  ;;  %1758 = vmatpush.bf16.msrb.mxu0 %v1702_v39 }
 0x374   : >> { %v1641_v26 = vpop.f32.mrf.mxu3  ;;  %1777 = vmatpush.bf16.msrb.mxu1 %v1703_v20  ;;  %v1623_v6 = vadd.f32 %v1622_v11, %v3423_v32 }
 0x375   : >> { %v1642_v7 = vadd.f32 %v1641_v26, %v3423_v32  ;;  %v3727_v32 = vld [vmem:[#allocation52_spill] sm:$0xff] }
 0x376   : >> { %2432 = vmatmul.msk.bf16.vlgmr.msrb.gmra.mxu0 %vm671_vm0, %v3486_v12  ;;  %v805_v13 = vadd.f32 %v3727_v32, %v3419_v23 }
 0x377   : >> { %2434 = vmatmul.msk.bf16.vlgmr.msrb.gmra.mxu1 %vm671_vm0, %v3486_v12  ;;  %v1656_v14 = vadd.f32 %v1642_v7, %v3370_v2  ;;  %v3731_v2 = vld [vmem:[#allocation42_spill] sm:$0xff] }
 0x37b   : >> { %v1625_v49 = vpop.f32.mrf.mxu2 }
 0x37c   : >> { %v1644_v30 = vpop.f32.mrf.mxu3  ;;  %v1626_v4 = vadd.f32 %v1625_v49, %v3413_v34 }
 0x37d   : >> { %v1645_v16 = vadd.f32 %v1644_v30, %v3413_v34  ;;  %v3726_v34 = vld [vmem:[#allocation47_spill] sm:$0xff] }
 0x37e   : >> { %v1659_v17 = vadd.f32 %v1626_v4, %v3358_v53  ;;  %v839_v59 = vadd.f32 %v3726_v34, %v3429_v8  ;;  %v3729_v53 = vld [vmem:[#allocation51_spill] sm:$0xff]  ;;  %v3730_v8 = vld [vmem:[#allocation53_spill] sm:$0xff] }
 0x37f   : >> { %v1660_v1 = vadd.f32 %v1645_v16, %v3360_v10  ;;  %v842_v33 = vadd.f32 %v3729_v53, %v3415_v51  ;;  %v1655_v10 = vadd.f32 %v1623_v6, %v3368_v35  ;;  %v844_v41 = vadd.f32 %v3730_v8, %v3419_v23  ;;  %v3732_v23 = vld [vmem:[#allocation43_spill] sm:$0xff] }
 0x380   : >> { %v3521_v43 = vadd.f32 %v1659_v17, %v803_v24  ;;  %v837_v60 = vadd.f32 %v3732_v23, %v3441_v27  ;;  %v3535_v0 = vadd.f32 %v1656_v14, %v839_v59 }
 0x381   : >> { %v3523_v51 = vadd.f32 %v1660_v1, %v842_v33  ;;  %v3533_v37 = vadd.f32 %v1655_v10, %v800_v38  ;;  %v1723_v38 = vpop.permute.xlu0 %1722 }
 0x382   : >> { %v1696_v19 = vmax.f32 %v3521_v43, 0.0  ;;  %v1693_v20 = vmax.f32 %v3535_v0, 0.0 }
 0x383   : >> { %v1627_v56 = vpop.f32.mrf.mxu2  ;;  %v1697_v47 = vmax.f32 %v3523_v51, 0.0  ;;  %v1692_v39 = vmax.f32 %v3533_v37, 0.0 }
 0x384   : >> { %v1646_v55 = vpop.f32.mrf.mxu3  ;;  %v1628_v3 = vadd.f32 %v1627_v56, %v3411_v45 }
 0x385   : >> { %v1647_v58 = vadd.f32 %v1646_v55, %v3411_v45  ;;  %v798_v45 = vadd.f32 %v3731_v2, %v3441_v27  ;;  %v2494_v2 = vld [vmem:[%s3622_s7 + $0x20] sm:$0xff] }
 0x386   : >> { %v1663_v48 = vadd.f32 %v1628_v3, %v3372_v63  ;;  %2433 = vmatmul.msk.bf16.gmra.mxu0 %vm671_vm0, %v2493_v44 }
 0x387   : >> { %v1664_v35 = vadd.f32 %v1647_v58, %v3374_v9  ;;  %2435 = vmatmul.msk.bf16.gmra.mxu1 %vm671_vm0, %v2493_v44  ;;  %v3541_v63 = vadd.f32 %v1651_v29, %v798_v45  ;;  %v3543_v9 = vadd.f32 %v1652_v57, %v837_v60 }
 0x388   : >> { %v3537_v25 = vadd.f32 %v1663_v48, %v805_v13  ;;  %v1718_v13 = vpop.permute.xlu2 %1717 }
 0x389   : >> { %v3539_v31 = vadd.f32 %v1664_v35, %v844_v41  ;;  %v1688_v11 = vmax.f32 %v3541_v63, 0.0  ;;  %v1689_v26 = vmax.f32 %v3543_v9, 0.0 }
 0x38a   : >> { %v1700_v50 = vmax.f32 %v3537_v25, 0.0 }
 0x38b   : >> { %v1701_v27 = vmax.f32 %v3539_v31, 0.0  ;;  %v1704_v49 = vpack.c.bf16 %v1692_v39, %v1688_v11  ;;  %v1705_v30 = vpack.c.bf16 %v1693_v20, %v1689_v26 }
 0x38c   : >> { %v1708_v61 = vpack.c.bf16 %v1700_v50, %v1696_v19 }
 0x38d   : >> { %v1709_v28 = vpack.c.bf16 %v1701_v27, %v1697_v47  ;;  %v2495_v47 = vld [vmem:[%s3622_s7 + $0x28] sm:$0xff] }
 0x38e   : >> { %1795 = vmatpush.bf16.msrb.mxu2 %v1708_v61 }
 0x38f   : >> { %1814 = vmatpush.bf16.msrb.mxu3 %v1709_v28 }
 0x392   : >> { %1796 = vmatpush.bf16.msrb.mxu2 %v1704_v49 }
 0x393   : >> { %1815 = vmatpush.bf16.msrb.mxu3 %v1705_v30 }
 0x395   : >> { %2436 = vmatmul.msk.bf16.vlgmr.msrb.gmra.mxu2 %vm671_vm0, %v3486_v12 }
 0x396   : >> { %2438 = vmatmul.msk.bf16.vlgmr.msrb.gmra.mxu3 %vm671_vm0, %v3486_v12 }
 0x3a5   : >> { %2437 = vmatmul.msk.bf16.gmra.mxu2 %vm671_vm0, %v2493_v44 }
 0x3a6   : >> { %2439 = vmatmul.msk.bf16.gmra.mxu3 %vm671_vm0, %v2493_v44 }
 0x3f3   : >> { %v1760_v4 = vpop.f32.mrf.mxu0 }
 0x3f4   : >> { %v1779_v16 = vpop.f32.mrf.mxu1  ;;  %v1761_v33 = vadd.f32 %v1760_v4, %v1718_v13 }
 0x3f5   : >> { %v1780_v44 = vadd.f32 %v1779_v16, %v1718_v13 }
 0x3f6   : >> { %v1832_v29 = vmax.f32 %v1761_v33, 0.0 }
 0x3f7   : >> { %v1833_v57 = vmax.f32 %v1780_v44, 0.0  ;;  %v1864_v44 = vpop.permute.xlu1 %1863 }
 0x3fb   : >> { %v1762_v6 = vpop.f32.mrf.mxu0 }
 0x3fc   : >> { %v1781_v7 = vpop.f32.mrf.mxu1  ;;  %v1763_v36 = vadd.f32 %v1762_v6, %v1723_v38 }
 0x3fd   : >> { %v1782_v12 = vadd.f32 %v1781_v7, %v1723_v38 }
 0x3fe   : >> { %v1836_v3 = vmax.f32 %v1763_v36, 0.0 }
 0x3ff   : >> { %v1837_v58 = vmax.f32 %v1782_v12, 0.0 }
 0x400   : >> { %v1848_v48 = vpack.c.bf16 %v1836_v3, %v1832_v29 }
 0x401   : >> { %v1849_v35 = vpack.c.bf16 %v1837_v58, %v1833_v57 }
 0x403   : >> { %v1765_v54 = vpop.f32.mrf.mxu0 }
 0x404   : >> { %v1784_v17 = vpop.f32.mrf.mxu1  ;;  %v1766_v1 = vadd.f32 %v1765_v54, %v1728_v62 }
 0x405   : >> { %v1785_v34 = vadd.f32 %v1784_v17, %v1728_v62 }
 0x406   : >> { %v1840_v56 = vmax.f32 %v1766_v1, 0.0 }
 0x407   : >> { %v1841_v55 = vmax.f32 %v1785_v34, 0.0 }
 0x40b   : >> { %v1767_v59 = vpop.f32.mrf.mxu0 }
 0x40c   : >> { %v1786_v32 = vpop.f32.mrf.mxu1  ;;  %v1768_v24 = vadd.f32 %v1767_v59, %v1733_v42 }
 0x40d   : >> { %v1787_v53 = vadd.f32 %v1786_v32, %v1733_v42 }
 0x40e   : >> { %v1844_v10 = vmax.f32 %v1768_v24, 0.0 }
 0x40f   : >> { %v1845_v14 = vmax.f32 %v1787_v53, 0.0 }
 0x410   : >> { %v1852_v8 = vpack.c.bf16 %v1844_v10, %v1840_v56  ;;  %v1869_v56 = vpop.permute.xlu2 %1868 }
 0x411   : >> { %v1853_v41 = vpack.c.bf16 %v1845_v14, %v1841_v55  ;;  %v1874_v14 = vpop.permute.xlu0 %1873 }
 0x412   : >> { %1903 = vmatpush.bf16.msra.mxu0 %v1852_v8 }
 0x413   : >> { %1922 = vmatpush.bf16.msra.mxu1 %v1853_v41  ;;  %v3573_v41 = vpop.permute.xlu1 %1878 }
 0x416   : >> { %1904 = vmatpush.bf16.msra.mxu0 %v1848_v48 }
 0x417   : >> { %1923 = vmatpush.bf16.msra.mxu1 %v1849_v35 }
 0x418   : >> { %v1798_v45 = vpop.f32.mrf.mxu2  ;;  %v3577_v48 = vpop.permute.xlu2 %2007 }
 0x419   : >> { %v1817_v23 = vpop.f32.mrf.mxu3  ;;  %2456 = vmatmul.msk.bf16.vlgmr.msra.gmra.mxu0 %vm671_vm0, %v2494_v2  ;;  %v1799_v4 = vadd.f32 %v1798_v45, %v1718_v13 }
 0x41a   : >> { %2458 = vmatmul.msk.bf16.vlgmr.msra.gmra.mxu1 %vm671_vm0, %v2494_v2  ;;  %v1818_v16 = vadd.f32 %v1817_v23, %v1718_v13 }
 0x41b   : >> { %v1834_v36 = vmax.f32 %v1799_v4, 0.0 }
 0x41c   : >> { %v1835_v12 = vmax.f32 %v1818_v16, 0.0 }
 0x420   : >> { %v1800_v60 = vpop.f32.mrf.mxu2 }
 0x421   : >> { %v1819_v19 = vpop.f32.mrf.mxu3  ;;  %v1801_v11 = vadd.f32 %v1800_v60, %v1723_v38 }
 0x422   : >> { %v1820_v26 = vadd.f32 %v1819_v19, %v1723_v38 }
 0x423   : >> { %v1838_v1 = vmax.f32 %v1801_v11, 0.0  ;;  %v2013_v11 = vpop.permute.xlu0 %2012 }
 0x424   : >> { %v1839_v34 = vmax.f32 %v1820_v26, 0.0 }
 0x426   : >> { %v1851_v24 = vpack.c.bf16 %v1839_v34, %v1835_v12 }
 0x428   : >> { %v1803_v50 = vpop.f32.mrf.mxu2 }
 0x429   : >> { %v1822_v27 = vpop.f32.mrf.mxu3  ;;  %2457 = vmatmul.msk.bf16.gmra.mxu0 %vm671_vm0, %v2495_v47  ;;  %v1804_v61 = vadd.f32 %v1803_v50, %v1728_v62 }
 0x42a   : >> { %2459 = vmatmul.msk.bf16.gmra.mxu1 %vm671_vm0, %v2495_v47  ;;  %v1823_v28 = vadd.f32 %v1822_v27, %v1728_v62  ;;  %v1850_v62 = vpack.c.bf16 %v1838_v1, %v1834_v36 }
 0x42b   : >> { %v1842_v6 = vmax.f32 %v1804_v61, 0.0 }
 0x42c   : >> { %v1843_v7 = vmax.f32 %v1823_v28, 0.0 }
 0x430   : >> { %v1805_v39 = vpop.f32.mrf.mxu2 }
 0x431   : >> { %v1824_v20 = vpop.f32.mrf.mxu3  ;;  %v1806_v49 = vadd.f32 %v1805_v39, %v1733_v42 }
 0x432   : >> { %v1825_v30 = vadd.f32 %v1824_v20, %v1733_v42 }
 0x433   : >> { %v1846_v54 = vmax.f32 %v1806_v49, 0.0 }
 0x434   : >> { %v1847_v17 = vmax.f32 %v1825_v30, 0.0  ;;  %v2018_v30 = vpop.permute.xlu1 %2017 }
 0x435   : >> { %v1854_v59 = vpack.c.bf16 %v1846_v54, %v1842_v6 }
 0x436   : >> { %v1855_v32 = vpack.c.bf16 %v1847_v17, %v1843_v7 }
 0x437   : >> { %1941 = vmatpush.bf16.msra.mxu2 %v1854_v59 }
 0x438   : >> { %1960 = vmatpush.bf16.msra.mxu3 %v1855_v32 }
 0x43b   : >> { %1942 = vmatpush.bf16.msra.mxu2 %v1850_v62 }
 0x43c   : >> { %1961 = vmatpush.bf16.msra.mxu3 %v1851_v24 }
 0x43e   : >> { %2460 = vmatmul.msk.bf16.vlgmr.msra.gmra.mxu2 %vm671_vm0, %v2494_v2 }
 0x43f   : >> { %2462 = vmatmul.msk.bf16.vlgmr.msra.gmra.mxu3 %vm671_vm0, %v2494_v2 }
 0x44e   : >> { %2461 = vmatmul.msk.bf16.gmra.mxu2 %vm671_vm0, %v2495_v47 }
 0x44f   : >> { %2463 = vmatmul.msk.bf16.gmra.mxu3 %vm671_vm0, %v2495_v47 }
 0x496   : >> { %v1906_v38 = vpop.f32.mrf.mxu0 }
 0x497   : >> { %v1925_v42 = vpop.f32.mrf.mxu1  ;;  %v1907_v19 = vadd.f32 %v1906_v38, %v1864_v44 }
 0x498   : >> { %v1926_v58 = vadd.f32 %v1925_v42, %v1864_v44 }
 0x49a   : >> { %v1974_v35 = vadd.f32 %v1926_v58, %v3473_v40  ;;  %v1973_v40 = vadd.f32 %v1907_v19, %v3471_v22 }
 0x49c   : >> { %v1990_v28 = vmax.f32 %v1974_v35, 0.0  ;;  %v1989_v17 = vmax.f32 %v1973_v40, 0.0 }
 0x49e   : >> { %v1908_v53 = vpop.f32.mrf.mxu0  ;;  %v2026_v4 = vmul.f32 %v3577_v48, %v1990_v28 }
 0x49f   : >> { %v1927_v13 = vpop.f32.mrf.mxu1  ;;  %v1909_v2 = vadd.f32 %v1908_v53, %v1869_v56 }
 0x4a0   : >> { %v1928_v10 = vadd.f32 %v1927_v13, %v1869_v56 }
 0x4a2   : >> { %v1978_v29 = vadd.f32 %v1928_v10, %v3465_v15  ;;  %v1977_v15 = vadd.f32 %v1909_v2, %v3463_v52  ;;  %v2023_v52 = vpop.permute.xlu2 %2022 }
 0x4a4   : >> { %v1994_v50 = vmax.f32 %v1978_v29, 0.0  ;;  %v1993_v16 = vmax.f32 %v1977_v15, 0.0 }
 0x4a6   : >> { %v1911_v55 = vpop.f32.mrf.mxu0  ;;  %v2030_v26 = vmul.f32 %v2013_v11, %v1994_v50  ;;  %v2029_v32 = vmul.f32 %v2013_v11, %v1993_v16 }
 0x4a7   : >> { %v1930_v33 = vpop.f32.mrf.mxu1  ;;  %v1912_v27 = vadd.f32 %v1911_v55, %v1874_v14 }
 0x4a8   : >> { %v1931_v8 = vadd.f32 %v1930_v33, %v1874_v14  ;;  %v2050_v1 = vadd.f32 %v2030_v26, %v2026_v4 }
 0x4aa   : >> { %v1982_v45 = vadd.f32 %v1931_v8, %v3455_v5  ;;  %v1981_v5 = vadd.f32 %v1912_v27, %v3453_v18  ;;  %v2025_v18 = vmul.f32 %v3577_v48, %v1989_v17 }
 0x4ac   : >> { %v1998_v39 = vmax.f32 %v1982_v45, 0.0  ;;  %v1997_v34 = vmax.f32 %v1981_v5, 0.0  ;;  %v2041_v53 = vadd.f32 %v2029_v32, %v2025_v18 }
 0x4ae   : >> { %v1913_v47 = vpop.f32.mrf.mxu0  ;;  %v2034_v6 = vmul.f32 %v2018_v30, %v1998_v39  ;;  %v2033_v24 = vmul.f32 %v2018_v30, %v1997_v34 }
 0x4af   : >> { %v1932_v3 = vpop.f32.mrf.mxu1  ;;  %v1914_v20 = vadd.f32 %v1913_v47, %v3573_v41 }
 0x4b0   : >> { %v1933_v57 = vadd.f32 %v1932_v3, %v3573_v41  ;;  %v2051_v22 = vadd.f32 %v2050_v1, %v2034_v6  ;;  %v2042_v29 = vadd.f32 %v2041_v53, %v2033_v24 }
 0x4b2   : >> { %v1986_v61 = vadd.f32 %v1933_v57, %v3469_v21  ;;  %v1985_v21 = vadd.f32 %v1914_v20, %v3467_v46 }
 0x4b4   : >> { %v2002_v49 = vmax.f32 %v1986_v61, 0.0  ;;  %v2001_v36 = vmax.f32 %v1985_v21, 0.0 }
 0x4b6   : >> { %v2038_v59 = vmul.f32 %v2023_v52, %v2002_v49  ;;  %v2037_v46 = vmul.f32 %v2023_v52, %v2001_v36 }
 0x4b8   : >> { %v2052_v42 = vadd.f32 %v2051_v22, %v2038_v59  ;;  %v2043_v45 = vadd.f32 %v2042_v29, %v2037_v46 }
 0x4ba   : >> { %v2053_v57 = vrot.slane %v2052_v42, 4  ;;  %v2044_v27 = vrot.slane %v2043_v45, 4 }
 0x4bc   : >> { %v2054_v19 = vadd.f32 %v2053_v57, %v2052_v42  ;;  %v2045_v49 = vadd.f32 %v2044_v27, %v2043_v45 }
 0x4be   : >> { %v2046_v1 = vrot.slane %v2045_v49, 2 }
 0x4c0   : >> { %v2047_v22 = vadd.f32 %v2046_v1, %v2045_v49 }
 0x4c1   : >> { %v1944_v23 = vpop.f32.mrf.mxu2 }
 0x4c2   : >> { %v1963_v60 = vpop.f32.mrf.mxu3  ;;  %v1945_v38 = vadd.f32 %v1944_v23, %v1864_v44  ;;  %v2048_v42 = vrot.slane %v2047_v22, 1 }
 0x4c3   : >> { %v1964_v13 = vadd.f32 %v1963_v60, %v1864_v44 }
 0x4c4   : >> { %v1975_v35 = vadd.f32 %v1945_v38, %v3541_v63 }
 0x4c6   : >> { %v1991_v47 = vmax.f32 %v1975_v35, 0.0 }
 0x4c9   : >> { %v1946_v7 = vpop.f32.mrf.mxu2 }
 0x4ca   : >> { %v1965_v54 = vpop.f32.mrf.mxu3  ;;  %v1947_v12 = vadd.f32 %v1946_v7, %v1869_v56 }
 0x4cb   : >> { %v1966_v62 = vadd.f32 %v1965_v54, %v1869_v56  ;;  %v1976_v56 = vadd.f32 %v1964_v13, %v3543_v9 }
 0x4cc   : >> { %v1979_v10 = vadd.f32 %v1947_v12, %v3533_v37 }
 0x4cd   : >> { %v1980_v3 = vadd.f32 %v1966_v62, %v3535_v0  ;;  %v1992_v37 = vmax.f32 %v1976_v56, 0.0 }
 0x4ce   : >> { %v1995_v23 = vmax.f32 %v1979_v10, 0.0 }
 0x4cf   : >> { %v1996_v60 = vmax.f32 %v1980_v3, 0.0  ;;  %v2028_v39 = vmul.f32 %v3577_v48, %v1992_v37  ;;  %v2102_v3 = vlaneseq }
 0x4d0   : >> { %v2031_v28 = vmul.f32 %v2013_v11, %v1995_v23 }
 0x4d1   : >> { %v1949_v33 = vpop.f32.mrf.mxu2  ;;  %v2032_v15 = vmul.f32 %v2013_v11, %v1996_v60  ;;  %vm2104_vm4 = vcmp.lt.s32.totalorder %v2102_v3, 512 }
 0x4d2   : >> { %v1968_v55 = vpop.f32.mrf.mxu3  ;;  %v1950_v58 = vadd.f32 %v1949_v33, %v1874_v14  ;;  %v2049_v33 = vadd.f32 %v2048_v42, %v2047_v22 }
 0x4d3   : >> { %v1969_v8 = vadd.f32 %v1968_v55, %v1874_v14  ;;  %v2068_v16 = vadd.f32 %v2032_v15, %v2028_v39 }
 0x4d4   : >> { %v1983_v2 = vadd.f32 %v1950_v58, %v3521_v43  ;;  %v2055_v43 = vrot.slane %v2054_v19, 2 }
 0x4d5   : >> { %v1984_v44 = vadd.f32 %v1969_v8, %v3523_v51  ;;  %v2027_v51 = vmul.f32 %v3577_v48, %v1991_v47 }
 0x4d6   : >> { %v1999_v50 = vmax.f32 %v1983_v2, 0.0  ;;  %v2056_v21 = vadd.f32 %v2055_v43, %v2054_v19 }
 0x4d7   : >> { %v2000_v0 = vmax.f32 %v1984_v44, 0.0  ;;  %v2059_v4 = vadd.f32 %v2031_v28, %v2027_v51 }
 0x4d8   : >> { %v2035_v20 = vmul.f32 %v2018_v30, %v1999_v50  ;;  %v2057_v48 = vrot.slane %v2056_v21, 1 }
 0x4d9   : >> { %v1951_v14 = vpop.f32.mrf.mxu2  ;;  %v2036_v40 = vmul.f32 %v2018_v30, %v2000_v0 }
 0x4da   : >> { %v1970_v61 = vpop.f32.mrf.mxu3  ;;  %v1952_v63 = vadd.f32 %v1951_v14, %v3573_v41  ;;  %v2060_v7 = vadd.f32 %v2059_v4, %v2035_v20  ;;  %v2058_v18 = vadd.f32 %v2057_v48, %v2056_v21 }
 0x4db   : >> { %v1971_v9 = vadd.f32 %v1970_v61, %v3573_v41  ;;  %v2069_v54 = vadd.f32 %v2068_v16, %v2036_v40 }
 0x4dc   : >> { %v1987_v26 = vadd.f32 %v1952_v63, %v3537_v25 }
 0x4dd   : >> { %v1988_v5 = vadd.f32 %v1971_v9, %v3539_v31  ;;  %v2080_v31 = vpop.permute.xlu0 %2079 }
 0x4de   : >> { %v2003_v6 = vmax.f32 %v1987_v26, 0.0  ;;  %v2082_v24 = vperm.slane %v2080_v31, 0 }
 0x4df   : >> { %v2004_v11 = vmax.f32 %v1988_v5, 0.0 }
 0x4e0   : >> { %v2039_v41 = vmul.f32 %v2023_v52, %v2003_v6  ;;  %v2084_v53 = vadd.f32 %v2082_v24, %v2058_v18  ;;  %v2083_v57 = vadd.f32 %v2082_v24, %v2049_v33 }
 0x4e1   : >> { %v2040_v17 = vmul.f32 %v2023_v52, %v2004_v11 }
 0x4e2   : >> { %v2061_v34 = vadd.f32 %v2060_v7, %v2039_v41  ;;  %v2091_v58 = vrot.slane %v2084_v53, 7 }
 0x4e3   : >> { %v2070_v59 = vadd.f32 %v2069_v54, %v2040_v17 }
 0x4e4   : >> { %v2062_v32 = vrot.slane %v2061_v34, 4  ;;  %v2095_v2 = vsel %vm2094_vm1, %v2083_v57, %v2091_v58 }
 0x4e5   : >> { %v2071_v30 = vrot.slane %v2070_v59, 4 }
 0x4e6   : >> { %v2063_v25 = vadd.f32 %v2062_v32, %v2061_v34 }
 0x4e7   : >> { %v2072_v36 = vadd.f32 %v2071_v30, %v2070_v59 }
 0x4e8   : >> { %v2064_v12 = vrot.slane %v2063_v25, 2 }
 0x4e9   : >> { %v2073_v62 = vrot.slane %v2072_v36, 2 }
 0x4ea   : >> { %v2065_v38 = vadd.f32 %v2064_v12, %v2063_v25 }
 0x4eb   : >> { %v2074_v13 = vadd.f32 %v2073_v62, %v2072_v36 }
 0x4ec   : >> { %v2066_v52 = vrot.slane %v2065_v38, 1 }
 0x4ed   : >> { %v2075_v46 = vrot.slane %v2074_v13, 1 }
 0x4ee   : >> { %v2067_v55 = vadd.f32 %v2066_v52, %v2065_v38 }
 0x4ef   : >> { %v2076_v10 = vadd.f32 %v2075_v46, %v2074_v13 }
 0x4f0   : >> { %v2085_v8 = vadd.f32 %v2082_v24, %v2067_v55 }
 0x4f1   : >> { %v2086_v29 = vadd.f32 %v2082_v24, %v2076_v10 }
 0x4f2   : >> { %v2092_v35 = vrot.slane %v2085_v8, 6 }
 0x4f3   : >> { %v2093_v56 = vrot.slane %v2086_v29, 5  ;;  %528 = sbr.rel (!%p526_p5) target bundleno = 47 (0x2f), region = 118 }
 0x4f5   : >> { %v2097_v44 = vsel %vm2096_vm2, %v2092_v35, %v2093_v56 }
 0x4f6   : >> { %v2099_v45 = vsel %vm2098_vm3, %v2095_v2, %v2097_v44 }
 0x4f7   : >> { %2106 = vst.msk [vmem:[%s2101_s13] sm:$0xf] %vm2104_vm4, %v2099_v45 }
 0x4f8 PF: > { %s23_s21 = sadd.s32 1, %s2570_s21   ;;  %s3733_s19 = smov %s2566_s20 }
 0x4f9   : > { %p20_p6 = scmp.ge.s32.totalorder %s23_s21, 4   ;;  %s3734_s20 = smov %s3736_s10 }
 0x4fb   :  { %22 = sbr.rel (!%p20_p6) target bundleno = 3 (0x3), region = 129 }

</bundles_post_ra>
